<compile_context>
chip_gen: v7x
topology: tpu7x:2x2x1
jax: 0.10.0
libtpu: 0.0.40
codegen_flags: <defaults>
</compile_context>

<pallas_src>
import jax
import jax.numpy as jnp
import numpy as np
from jax.experimental import pallas as pl
from jax.experimental.pallas import tpu as pltpu


def _attention_kernel(dproj_ref, enc_ref, bias_ref, wenc_ref, v_ref, out_ref):
    """One grid step = one tile of TB batch elements.

    dproj_ref : (TB, 1, D_dec)   f32   decoder_state @ W_dec + b (precomputed)
    enc_ref   : (TB*S, D_enc)    f32   flattened encoder tile (batch-major)
    bias_ref  : (1, TB, S)       f32   additive mask bias (0 keep / -1e9 drop)
    wenc_ref  : (D_enc, D_dec)   bf16  encoder half of attention_transform.weight^T
    v_ref     : (1, 1, D_dec)    f32   attention_scorer weight
    out_ref   : (1, TB, S)       f32   softmax attention weights (lane-dense in S)
    """
    tb = dproj_ref.shape[0]
    d_dec = dproj_ref.shape[2]
    s = out_ref.shape[2]

    # Cast to bf16 in-kernel (VPU pass) so the MXU runs a single bf16 pass with
    # f32 accumulation; the encoder stays f32 in HBM (single read, no cast copy).
    enc_bf16 = enc_ref[...].astype(jnp.bfloat16)                       # (TB*S, D_enc)
    enc_proj = jnp.dot(enc_bf16, wenc_ref[...],
                       preferred_element_type=jnp.float32)             # (TB*S, D_dec)

    # concat([dec, enc]) @ W^T + b  ==  enc @ W_enc + (dec @ W_dec + b).
    # The reshape regroups whole (s_pad, D) sublane slabs (s_pad % 128 == 0);
    # the (TB, 1, D_dec) add is a sublane broadcast per batch element.
    feats = jnp.tanh(enc_proj.reshape(tb, s, d_dec) + dproj_ref[...])  # (TB, S, D)

    # Scorer: contract D_dec (the lane axis) -> lane-dense (TB, S) scores,
    # then apply the additive mask bias (padded columns carry -1e9 too).
    scores = jnp.sum(feats * v_ref[...], axis=-1) + bias_ref[0]        # (TB, S) f32

    # Numerically stable softmax along S (the lane axis).
    m = jnp.max(scores, axis=-1, keepdims=True)                        # (TB, 1)
    e = jnp.exp(scores - m)                                            # (TB, S)
    denom = jnp.sum(e, axis=-1, keepdims=True)                         # (TB, 1)
    out_ref[0] = e * pl.reciprocal(denom, approx=True)                 # EUP recip


def _vmem_config():
    """(vmem_limit_bytes, per-step tile budget, has_two_tensorcores)."""
    vmem_phys = 128 * 1024 * 1024
    try:
        info = pltpu.get_tpu_info()
        vmem_phys = int(getattr(info, "vmem_capacity_bytes", vmem_phys))
    except Exception:
        pass
    if vmem_phys <= 64 * 1024 * 1024:
        # v7x-class: 64 MiB physical VMEM per TC, 2 TensorCores per chip.
        return 32 * 1024 * 1024, 8 * 1024 * 1024, True
    # v5e / v6e: 128 MiB physical VMEM, single TensorCore.
    return 64 * 1024 * 1024, 24 * 1024 * 1024, False


def _choose_batch_tile(batch, s_pad, d_enc, d_dec, tile_budget_bytes,
                       target_rows=8192, two_tensorcores=False):
    """Pick the per-grid-step batch tile TB (B is padded to a multiple of TB).

    Sized so TB*s_pad rows give several MiB of encoder per step (HBM-bound
    kernel: bigger tiles -> higher fraction of HBM roofline) while the
    double-buffered f32 encoder tile + in-kernel bf16 copy + f32 temporaries
    stay inside the per-generation scoped VMEM budget. Lane dims are rounded
    up to 128 (and rows to sublane multiples, already guaranteed by s_pad%128)
    when estimating the footprint.
    """
    d_enc_p = max(128, ((d_enc + 127) // 128) * 128)
    d_dec_p = max(128, ((d_dec + 127) // 128) * 128)

    def tile_bytes(tb):
        rows = tb * s_pad
        enc_in = rows * d_enc_p * 4 * 2        # f32 encoder tile, double-buffered
        enc_b16 = rows * d_enc_p * 2           # in-kernel bf16 cast copy
        proj = rows * d_dec_p * 4 * 2          # enc_proj + feats f32 temporaries
        lanes = tb * s_pad * 4 * 4             # scores / exp / bias / output
        small = tb * d_dec_p * 4 * 2 + d_enc_p * d_dec_p * 2 * 2 + d_dec_p * 4 * 2
        return enc_in + enc_b16 + proj + lanes + small

    best = 1
    for tb in range(1, batch + 1):
        if tile_bytes(tb) > tile_budget_bytes:
            break
        best = tb
        if tb * s_pad >= target_rows:
            break

    # Only on 2-TC parts (v7x): prefer >= 2 grid steps so dimension_semantics
    # ("parallel",) shards across both TensorCores -- but never shrink the tile
    # below ~2048 rows, or per-step overhead dominates again.
    if two_tensorcores and -(-batch // best) < 2:
        half = (best + 1) // 2
        if half * s_pad >= 2048:
            best = half
    return best


def attention_mechanism(decoder_state, encoder_outputs, input_mask,
                        transform_w, transform_b, scorer_w):
    """Pallas equivalent of AttentionMechanism.forward.

    decoder_state   : (B, D_dec)               f32
    encoder_outputs : (B, S, D_enc)            f32
    input_mask      : (B, S)                   bool (True = keep)
    transform_w     : (D_dec, D_enc + D_dec)   torch nn.Linear weight
    transform_b     : (D_dec,)
    scorer_w        : (1, D_dec)               torch nn.Linear weight (no bias)
    returns         : (B, S)                   f32 softmax over S
    """
    B, S, D_enc = encoder_outputs.shape
    D_dec = decoder_state.shape[1]

    # torch Linear is x @ W.T + b; concat order is [decoder, encoder].
    w_t = transform_w.T.astype(jnp.float32)             # (D_dec + D_enc, D_dec)
    w_dec = w_t[:D_dec]                                  # (D_dec, D_dec) f32
    w_enc = w_t[D_dec:].astype(jnp.bfloat16)             # (D_enc, D_dec) bf16 for MXU
    v_row = scorer_w.reshape(1, 1, D_dec).astype(jnp.float32)

    # Decoder projection + bias done once (tiny (B,D)x(D,D) matmul) so the
    # kernel never runs an M=1 matmul per batch element.
    dec_proj = (decoder_state.astype(jnp.float32) @ w_dec
                + transform_b.astype(jnp.float32)[None, :])             # (B, D_dec)

    # Pad S to a multiple of 128: lane-dense (unmasked) stores for scores /
    # softmax / output; padded columns carry the same -1e9 additive bias.
    s_pad = ((S + 127) // 128) * 128

    vmem_limit, tile_budget, two_tc = _vmem_config()
    tb = _choose_batch_tile(B, s_pad, D_enc, D_dec, tile_budget,
                            target_rows=8192, two_tensorcores=two_tc)
    num_tiles = -(-B // tb)
    b_pad = num_tiles * tb

    enc = encoder_outputs.astype(jnp.float32)
    bias = jnp.where(input_mask, jnp.float32(0.0),
                     jnp.float32(-1000000000.0))                        # (B, S)
    if s_pad != S or b_pad != B:
        enc = jnp.pad(enc, ((0, b_pad - B), (0, s_pad - S), (0, 0)))
        bias = jnp.pad(bias, ((0, b_pad - B), (0, s_pad - S)),
                       constant_values=-1000000000.0)
        dec_proj = jnp.pad(dec_proj, ((0, b_pad - B), (0, 0)))

    dec_proj = dec_proj.reshape(b_pad, 1, D_dec)
    enc_flat = enc.reshape(b_pad * s_pad, D_enc)                        # f32 stream
    bias = bias.reshape(num_tiles, tb, s_pad)                           # lane-dense

    rows = b_pad * s_pad
    cost = pl.CostEstimate(
        flops=2 * rows * D_enc * D_dec + 4 * rows * D_dec + 6 * rows,
        transcendentals=rows * (D_dec + 1),
        bytes_accessed=(rows * D_enc * 4            # encoder read
                        + rows * 4 * 2              # bias read + output write
                        + b_pad * D_dec * 4         # decoder projection read
                        + D_enc * D_dec * 2 + D_dec * 4),
    )

    out = pl.pallas_call(
        _attention_kernel,
        out_shape=jax.ShapeDtypeStruct((num_tiles, tb, s_pad), jnp.float32),
        grid=(num_tiles,),
        in_specs=[
            pl.BlockSpec((tb, 1, D_dec), lambda i: (i, 0, 0)),          # dec_proj
            pl.BlockSpec((tb * s_pad, D_enc), lambda i: (i, 0)),        # enc (flat)
            pl.BlockSpec((1, tb, s_pad), lambda i: (i, 0, 0)),          # mask bias
            pl.BlockSpec((D_enc, D_dec), lambda i: (0, 0)),             # W_enc
            pl.BlockSpec((1, 1, D_dec), lambda i: (0, 0, 0)),           # scorer w
        ],
        out_specs=pl.BlockSpec((1, tb, s_pad), lambda i: (i, 0, 0)),
        compiler_params=pltpu.CompilerParams(
            dimension_semantics=("parallel",),
            vmem_limit_bytes=vmem_limit),
        cost_estimate=cost,
    )(dec_proj, enc_flat, bias, w_enc, v_row)

    out = out.reshape(b_pad, s_pad)
    return out[:B, :S]


def _reference(decoder_state, encoder_outputs, input_mask,
               transform_w, transform_b, scorer_w):
    B, S, _ = encoder_outputs.shape
    expanded = jnp.broadcast_to(decoder_state[:, None, :],
                                (B, S, decoder_state.shape[1]))
    concat = jnp.concatenate([expanded, encoder_outputs], axis=2)
    feats = jnp.tanh(concat @ transform_w.T + transform_b)
    scores = (feats @ scorer_w.T)[..., 0]
    scores = jnp.where(input_mask, scores, -1000000000.0)
    return jax.nn.softmax(scores, axis=1)


if __name__ == "__main__":
    B, S = 2, 8
    encoder_dim, decoder_dim = 32, 32

    key = jax.random.PRNGKey(0)
    k_dec, k_enc, k_w, k_b, k_v = jax.random.split(key, 5)

    decoder_state = jax.random.normal(k_dec, (B, decoder_dim), jnp.float32)
    encoder_outputs = jax.random.normal(k_enc, (B, S, encoder_dim), jnp.float32)
    lengths = jnp.array([S, 5], dtype=jnp.int32)
    input_mask = jnp.arange(S)[None, :] < lengths[:, None]        # (B, S) bool

    # deterministic parameter init (synthetic, not a checkpoint load)
    transform_w = jax.random.normal(
        k_w, (decoder_dim, encoder_dim + decoder_dim), jnp.float32) * 0.1
    transform_b = jax.random.normal(k_b, (decoder_dim,), jnp.float32) * 0.1
    scorer_w = jax.random.normal(k_v, (1, decoder_dim), jnp.float32) * 0.1

    out = attention_mechanism(decoder_state, encoder_outputs, input_mask,
                              transform_w, transform_b, scorer_w)
    out = jax.block_until_ready(out)

    ref = _reference(decoder_state, encoder_outputs, input_mask,
                     transform_w, transform_b, scorer_w)
    # bf16 MXU operands + approx reciprocal vs. the pure-f32 reference.
    np.testing.assert_allclose(np.asarray(out), np.asarray(ref),
                               rtol=2e-2, atol=5e-3)

    print("KERNEL_OK")
</pallas_src>

<mosaic_0001>
module attributes {stable_mosaic.version = 11 : i64} {
  func.func @_attention_kernel(%arg0: i32, %arg1: memref<2x1x32xf32, #tpu.memory_space<vmem>>, %arg2: memref<256x32xf32, #tpu.memory_space<vmem>>, %arg3: memref<1x2x128xf32, #tpu.memory_space<vmem>>, %arg4: memref<32x32xbf16, #tpu.memory_space<vmem>>, %arg5: memref<1x1x32xf32, #tpu.memory_space<vmem>>, %arg6: memref<1x2x128xf32, #tpu.memory_space<vmem>>) attributes {dimension_semantics = [#tpu.dimension_semantics<parallel>], iteration_bounds = array<i64: 1>, scalar_prefetch = 0 : i64, scratch_operands = 0 : i64, tpu.core_type = #tpu.core_type<tc>, window_params = [{transform_indices = @transform_0, window_bounds = array<i64: 2, 1, 32>}, {transform_indices = @transform_1, window_bounds = array<i64: 256, 32>}, {transform_indices = @transform_2, window_bounds = array<i64: 1, 2, 128>}, {pipeline_mode = #tpu.pipeline_mode<synchronous>, transform_indices = @transform_3, window_bounds = array<i64: 32, 32>}, {pipeline_mode = #tpu.pipeline_mode<synchronous>, transform_indices = @transform_4, window_bounds = array<i64: 1, 1, 32>}, {transform_indices = @transform_5, window_bounds = array<i64: 1, 2, 128>}]} {
    %c0 = arith.constant 0 : index
    %c0_0 = arith.constant 0 : index
    %0 = vector.load %arg2[%c0, %c0_0] : memref<256x32xf32, #tpu.memory_space<vmem>>, vector<256x32xf32>
    %1 = arith.truncf %0 : vector<256x32xf32> to vector<256x32xbf16>
    %c0_1 = arith.constant 0 : index
    %c0_2 = arith.constant 0 : index
    %2 = vector.load %arg4[%c0_1, %c0_2] : memref<32x32xbf16, #tpu.memory_space<vmem>>, vector<32x32xbf16>
    %cst = arith.constant dense<0.000000e+00> : vector<256x32xf32>
    %3 = tpu.matmul %1, %2, %cst {dimension_numbers = #tpu.dot_dimension_numbers<[1], [0], [0], [1], [0, 0, 1, 1], [], []>} : vector<256x32xbf16>, vector<32x32xbf16>, vector<256x32xf32> -> vector<256x32xf32>
    %4 = vector.shape_cast %3 : vector<256x32xf32> to vector<2x128x32xf32>
    %c0_3 = arith.constant 0 : index
    %c0_4 = arith.constant 0 : index
    %c0_5 = arith.constant 0 : index
    %5 = vector.load %arg1[%c0_3, %c0_4, %c0_5] : memref<2x1x32xf32, #tpu.memory_space<vmem>>, vector<2x1x32xf32>
    %6 = vector.broadcast %5 : vector<2x1x32xf32> to vector<2x128x32xf32>
    %7 = arith.addf %4, %6 : vector<2x128x32xf32>
    %8 = math.tanh %7 : vector<2x128x32xf32>
    %c0_6 = arith.constant 0 : index
    %c0_7 = arith.constant 0 : index
    %c0_8 = arith.constant 0 : index
    %9 = vector.load %arg5[%c0_6, %c0_7, %c0_8] : memref<1x1x32xf32, #tpu.memory_space<vmem>>, vector<1x1x32xf32>
    %10 = vector.broadcast %9 : vector<1x1x32xf32> to vector<2x128x32xf32>
    %11 = arith.mulf %8, %10 : vector<2x128x32xf32>
    %cst_9 = arith.constant dense<0.000000e+00> : vector<2x128xf32>
    %12 = vector.multi_reduction <add>, %11, %cst_9 [2] : vector<2x128x32xf32> to vector<2x128xf32>
    %c0_10 = arith.constant 0 : index
    %c0_11 = arith.constant 0 : index
    %c0_12 = arith.constant 0 : index
    %13 = vector.load %arg3[%c0_10, %c0_11, %c0_12] : memref<1x2x128xf32, #tpu.memory_space<vmem>>, vector<1x2x128xf32>
    %14 = vector.shape_cast %13 : vector<1x2x128xf32> to vector<2x128xf32>
    %15 = arith.addf %12, %14 : vector<2x128xf32>
    %cst_13 = arith.constant dense<0xFF800000> : vector<2xf32>
    %16 = vector.multi_reduction <maximumf>, %15, %cst_13 [1] : vector<2x128xf32> to vector<2xf32>
    %17 = vector.shape_cast %16 : vector<2xf32> to vector<2x1xf32>
    %18 = vector.broadcast %17 : vector<2x1xf32> to vector<2x128xf32>
    %19 = arith.subf %15, %18 : vector<2x128xf32>
    %20 = math.exp %19 : vector<2x128xf32>
    %cst_14 = arith.constant dense<0.000000e+00> : vector<2xf32>
    %21 = vector.multi_reduction <add>, %20, %cst_14 [1] : vector<2x128xf32> to vector<2xf32>
    %22 = vector.shape_cast %21 : vector<2xf32> to vector<2x1xf32>
    %23 = tpu.reciprocal %22 {approx = true} : vector<2x1xf32> -> vector<2x1xf32>
    %24 = vector.broadcast %23 : vector<2x1xf32> to vector<2x128xf32>
    %25 = arith.mulf %20, %24 : vector<2x128xf32>
    %c0_15 = arith.constant 0 : index
    %c0_16 = arith.constant 0 : index
    %c0_17 = arith.constant 0 : index
    %26 = vector.load %arg6[%c0_15, %c0_16, %c0_17] : memref<1x2x128xf32, #tpu.memory_space<vmem>>, vector<1x2x128xf32>
    %27 = vector.shape_cast %26 : vector<1x2x128xf32> to vector<2x128xf32>
    %28 = vector.shape_cast %25 : vector<2x128xf32> to vector<1x2x128xf32>
    tpu.vector_store %arg6[%c0_15, %c0_16, %c0_17], %28 {strides = array<i32>} : memref<1x2x128xf32, #tpu.memory_space<vmem>>, vector<1x2x128xf32>,
    return
  }
  func.func @transform_0(%arg0: i32) -> (i32, i32, i32) {
    %c0_i32 = arith.constant 0 : i32
    %c0_i32_0 = arith.constant 0 : i32
    %c0_i32_1 = arith.constant 0 : i32
    return %arg0, %c0_i32, %c0_i32_0 : i32, i32, i32
  }
  func.func @transform_1(%arg0: i32) -> (i32, i32) {
    %c0_i32 = arith.constant 0 : i32
    %c0_i32_0 = arith.constant 0 : i32
    return %arg0, %c0_i32 : i32, i32
  }
  func.func @transform_2(%arg0: i32) -> (i32, i32, i32) {
    %c0_i32 = arith.constant 0 : i32
    %c0_i32_0 = arith.constant 0 : i32
    %c0_i32_1 = arith.constant 0 : i32
    return %arg0, %c0_i32, %c0_i32_0 : i32, i32, i32
  }
  func.func @transform_3(%arg0: i32) -> (i32, i32) {
    %c0_i32 = arith.constant 0 : i32
    %c0_i32_0 = arith.constant 0 : i32
    %c0_i32_1 = arith.constant 0 : i32
    return %c0_i32, %c0_i32_0 : i32, i32
  }
  func.func @transform_4(%arg0: i32) -> (i32, i32, i32) {
    %c0_i32 = arith.constant 0 : i32
    %c0_i32_0 = arith.constant 0 : i32
    %c0_i32_1 = arith.constant 0 : i32
    %c0_i32_2 = arith.constant 0 : i32
    return %c0_i32, %c0_i32_0, %c0_i32_1 : i32, i32, i32
  }
  func.func @transform_5(%arg0: i32) -> (i32, i32, i32) {
    %c0_i32 = arith.constant 0 : i32
    %c0_i32_0 = arith.constant 0 : i32
    %c0_i32_1 = arith.constant 0 : i32
    return %arg0, %c0_i32, %c0_i32_0 : i32, i32, i32
  }
}

</mosaic_0001>

<bundles_post_ra>
// kernel: tpu_custom_call.1
= control target key start
LH: loop header
LB: loop body
LE: loop exit
PB: predicated region body
PF: predicated region fallthrough
CT: control target
= control target key end

     0   :  { %10 = vsyncpa [#allocation3], 0  ;;  %s3184_s0 = inlined_call_operand.hbm [shape: f32[2,1,32], index: 0, kind: input, shape index: {}]   ;;  %s3185_s1 = inlined_call_operand.hbm [shape: f32[256,32], index: 1, kind: input, shape index: {}]   ;;  %s3186_s2 = inlined_call_operand.hbm [shape: f32[1,2,128], index: 2, kind: input, shape index: {}]   ;;  %s3187_s3 = inlined_call_operand.hbm [shape: bf16[32,32], index: 3, kind: input, shape index: {}]   ;;  %s3188_s4 = inlined_call_operand.hbm [shape: f32[1,1,32], index: 4, kind: input, shape index: {}]   ;;  %s3189_s5 = inlined_call_operand.hbm [shape: f32[1,2,128], index: 5, kind: output, shape index: {}]  }
   0x1   :  { %11 = vsyncpa [#allocation6], 0 }
   0x2   :  { %12 = vsyncpa [#allocation9], 0 }
   0x3   :  { %13 = vsyncpa [#allocation4], 0  ;;  %s2212_s18 = smov [#allocation5]   ;;  %s2072_s22 = scalar_lea.hbm %s3185_s1, 4096 }
   0x4   :  { %s31_s19 = sshll.u32 %s2212_s18, 4  ;;  %p2073_p0 = scmp.ne.s32.totalorder %s3185_s1, %s2072_s22  ;;  %s32_s19 = int_to_ptr.vmem [resolvable:$true] %s31_s19 }
   0x5   :  { %p2076_p1 = scmp.lt.u32.totalorder %s2072_s22, %s3185_s1 }
   0x7   :  { %p2078_p2 = pnand %p2076_p1, %p2073_p0 }
   0x9   :  { %2081 = shalt.err (!%p2078_p2)
}
   0xa   :  { %s2082_s27 = scalar_lea.vmem %s32_s19, 4096  ;;  %p2087_p4 = scmp.lt.s32.totalorder %s32_s19, %s32_s19 }
   0xb   :  { %p2083_p3 = scmp.ne.s32.totalorder %s32_s19, %s2082_s27  ;;  %p2088_p5 = scmp.lt.s32.totalorder %s2082_s27, %s2082_s27 }
   0xd   :  { %p2089_p6 = por %p2088_p5, %p2087_p4 }
   0xf   :  { %p2090_p7 = pnand %p2089_p6, %p2083_p3 }
  0x11   :  { %2093 = shalt.err (!%p2090_p7)
}
  0x12   :  { %s2213_s28 = smov 128   ;;  %s2214_s29 = smov 8  }
  0x13   :  { %37 = dma.hbm_to_vmem [thread:$0]  %s3185_s1, 4096, %s32_s19, [#allocation6], %s2213_s28, %s2213_s28, %s2214_s29  }
  0x14   :  { %s2215_s7 = smov [#allocation8]   ;;  %s2094_s11 = scalar_lea.hbm %s3187_s3, 256 }
  0x15   :  { %s53_s8 = sshll.u32 %s2215_s7, 4  ;;  %p2095_p8 = scmp.ne.s32.totalorder %s3187_s3, %s2094_s11  ;;  %s54_s8 = int_to_ptr.vmem [resolvable:$true] %s53_s8 }
  0x16   :  { %p2098_p9 = scmp.lt.u32.totalorder %s2094_s11, %s3187_s3 }
  0x18   :  { %p2100_p10 = pnand %p2098_p9, %p2095_p8 }
  0x1a   :  { %2103 = shalt.err (!%p2100_p10)
}
  0x1b   :  { %s2104_s16 = scalar_lea.vmem %s54_s8, 256  ;;  %p2109_p12 = scmp.lt.s32.totalorder %s54_s8, %s54_s8 }
  0x1c   :  { %p2105_p11 = scmp.ne.s32.totalorder %s54_s8, %s2104_s16  ;;  %p2110_p13 = scmp.lt.s32.totalorder %s2104_s16, %s2104_s16 }
  0x1e   :  { %p2111_p0 = por %p2110_p13, %p2109_p12 }
  0x20   :  { %p2112_p1 = pnand %p2111_p0, %p2105_p11 }
  0x22   :  { %2115 = shalt.err (!%p2112_p1)
}
  0x23   :  { %s2216_s1 = smov 64   ;;  %s2217_s17 = smov 4  }
  0x24   :  { %59 = dma.hbm_to_vmem [thread:$0]  %s3187_s3, 256, %s54_s8, [#allocation9], %s2216_s1, %s2216_s1, %s2217_s17  }
  0x25   :  { %s2218_s20 = smov [#allocation2]   ;;  %s2116_s24 = scalar_lea.hbm %s3184_s0, 32 }
  0x26   :  { %s19_s21 = sshll.u32 %s2218_s20, 4  ;;  %p2117_p2 = scmp.ne.s32.totalorder %s3184_s0, %s2116_s24  ;;  %s20_s21 = int_to_ptr.vmem [resolvable:$true] %s19_s21 }
  0x27   :  { %p2120_p3 = scmp.lt.u32.totalorder %s2116_s24, %s3184_s0 }
  0x29   :  { %p2122_p4 = pnand %p2120_p3, %p2117_p2 }
  0x2b   :  { %2125 = shalt.err (!%p2122_p4)
}
  0x2c   :  { %s2126_s29 = scalar_lea.vmem %s20_s21, 32  ;;  %p2131_p6 = scmp.lt.s32.totalorder %s20_s21, %s20_s21 }
  0x2d   :  { %p2127_p5 = scmp.ne.s32.totalorder %s20_s21, %s2126_s29  ;;  %p2132_p7 = scmp.lt.s32.totalorder %s2126_s29, %s2126_s29 }
  0x2f   :  { %p2133_p8 = por %p2132_p7, %p2131_p6 }
  0x31   :  { %p2134_p9 = pnand %p2133_p8, %p2127_p5 }
  0x33   :  { %2137 = shalt.err (!%p2134_p9)
}
  0x34   :  { %s2219_s3 = smov 16   ;;  %s2220_s30 = smov 1  }
  0x35   :  { %25 = dma.hbm_to_vmem [thread:$0]  %s3184_s0, 32, %s20_s21, [#allocation3], %s2219_s3, %s2219_s3, %s2220_s30  }
  0x36   :  { %s2221_s8 = smov [#allocation7]   ;;  %s2222_s10 = smov [#allocation10]  }
  0x37   :  { %s44_s9 = sshll.u32 %s2221_s8, 4  ;;  %s66_s11 = sshll.u32 %s2222_s10, 4  ;;  %s45_s9 = int_to_ptr.vmem [resolvable:$true] %s44_s9  ;;  %s67_s11 = int_to_ptr.vmem [resolvable:$true] %s66_s11 }
  0x38   :  { %s2138_s14 = scalar_lea.hbm %s3186_s2, 32 }
  0x39   :  { %p2139_p10 = scmp.ne.s32.totalorder %s3186_s2, %s2138_s14  ;;  %p2142_p11 = scmp.lt.u32.totalorder %s2138_s14, %s3186_s2 }
  0x3b   :  { %p2144_p12 = pnand %p2142_p11, %p2139_p10 }
  0x3d   :  { %2147 = shalt.err (!%p2144_p12)
}
  0x3e   :  { %s2148_s0 = scalar_lea.vmem %s45_s9, 32  ;;  %p2153_p0 = scmp.lt.s32.totalorder %s45_s9, %s45_s9 }
  0x3f   :  { %p2149_p13 = scmp.ne.s32.totalorder %s45_s9, %s2148_s0  ;;  %p2154_p1 = scmp.lt.s32.totalorder %s2148_s0, %s2148_s0 }
  0x41   :  { %p2155_p2 = por %p2154_p1, %p2153_p0 }
  0x43   :  { %p2156_p3 = pnand %p2155_p2, %p2149_p13 }
  0x45   :  { %2159 = shalt.err (!%p2156_p3)
}
  0x46   :  { %47 = dma.hbm_to_vmem [thread:$0]  %s3186_s2, 32, %s45_s9, [#allocation6]  }
  0x47   :  { %s2160_s22 = scalar_lea.hbm %s3188_s4, 16 }
  0x48   :  { %p2161_p4 = scmp.ne.s32.totalorder %s3188_s4, %s2160_s22  ;;  %p2164_p5 = scmp.lt.u32.totalorder %s2160_s22, %s3188_s4 }
  0x4a   :  { %p2166_p6 = pnand %p2164_p5, %p2161_p4 }
  0x4c   :  { %2169 = shalt.err (!%p2166_p6)
}
  0x4d   :  { %s2170_s27 = scalar_lea.vmem %s67_s11, 16  ;;  %s2174_s28 = scalar_lea.vmem %s67_s11, 32 }
  0x4e   :  { %p2171_p7 = scmp.ne.s32.totalorder %s67_s11, %s2170_s27  ;;  %p2175_p8 = scmp.lt.s32.totalorder %s67_s11, %s67_s11 }
  0x4f   :  { %p2176_p9 = scmp.lt.s32.totalorder %s2174_s28, %s2170_s27 }
  0x51   :  { %p2177_p10 = por %p2176_p9, %p2175_p8 }
  0x53   :  { %p2178_p11 = pnand %p2177_p10, %p2171_p7 }
  0x55   :  { %2181 = shalt.err (!%p2178_p11)
}
  0x56   :  { %69 = dma.hbm_to_vmem [thread:$0]  %s3188_s4, 16, %s67_s11, [#allocation9]  }
  0x57   :  { %2204 = dma.done.wait [#allocation3], 32  }
  0x58   :  { %2205 = vsyncadd [#allocation3], 4294967264 }
  0x59   :  { %2206 = dma.done.wait [#allocation6], 4128  }
  0x5a   :  { %2207 = vsyncadd [#allocation6], 4294963168 }
  0x5b   :  { %2208 = dma.done.wait [#allocation9], 272  }
  0x5c   :  { %2209 = vsyncadd [#allocation9], 4294967024  ;;  %v1940_v0 = vld [vmem:[#allocation8] sm:$0xff]   ;;  %v1941_v1 = vld [vmem:[#allocation8 + $0x8] sm:$0xff]   ;;  %v575_v2 = vlaneseq  ;;  %vm150_vm0 = vcmask 261120   ;;  %vm912_vm1 = vcmask 130112  }
  0x5d   :  { %1885 = vmatprep.subr.bf16.mxu0 %v1940_v0  ;;  %1921 = vmatprep.subr.bf16.mxu1 %v1940_v0  ;;  %v86_v3 = vld [vmem:[#allocation5] sm:$0xff]  ;;  %v87_v4 = vld [vmem:[#allocation5 + $0x8] sm:$0xff]  ;;  %v88_v8 = vld [vmem:[#allocation5 + $0x10] sm:$0xff]  ;;  %vm919_vm2 = vcmask 195712   ;;  %vm3219_vm3 = vcmask 261312   ;;  %vm933_vm4 = vcmask 326912  }
  0x5e   :  { %v102_v5 = vld [vmem:[#allocation5 + $0x80] sm:$0xff]  ;;  %1886 = vmatpush3.bf16.msra.mxu0 %v1940_v0  ;;  %1923 = vmatpush3.bf16.msra.mxu1 %v1940_v0  ;;  %v118_v6 = vpack.c.bf16 %v87_v4, %v86_v3  ;;  %v103_v7 = vld [vmem:[#allocation5 + $0x88] sm:$0xff]  ;;  %v89_v9 = vld [vmem:[#allocation5 + $0x18] sm:$0xff]  ;;  %v2317_v15 = vshrl.u32 %v575_v2, 7  ;;  %vm940_vm5 = vcmask 392512   ;;  %vm947_vm6 = vcmask 458112  }
  0x5f   :  { %1887 = vmatprep.subr.bf16.mxu0 %v1941_v1  ;;  %1922 = vmatprep.subr.bf16.mxu1 %v1941_v1  ;;  %v126_v10 = vpack.c.bf16 %v103_v7, %v102_v5  ;;  %v104_v11 = vld [vmem:[#allocation5 + $0x90] sm:$0xff]  ;;  %v105_v12 = vld [vmem:[#allocation5 + $0x98] sm:$0xff]  ;;  %v90_v13 = vld [vmem:[#allocation5 + $0x20] sm:$0xff]  ;;  %v119_v16 = vpack.c.bf16 %v89_v9, %v88_v8  ;;  %vm954_vm7 = vcmask 523712   ;;  %vm961_vm8 = vcmask 589312   ;;  %s2224_s4 = smov [#allocation11]  }
  0x60   :  { %1889 = vmatprep.mubr.msk.bf16.mxu0 %vm150_vm0, %v118_v6  ;;  %v91_v14 = vld [vmem:[#allocation5 + $0x28] sm:$0xff]  ;;  %v127_v17 = vpack.c.bf16 %v105_v12, %v104_v11  ;;  %v106_v18 = vld [vmem:[#allocation5 + $0xa0] sm:$0xff]  ;;  %v2321_v22 = vsub.s32 0, %v2317_v15  ;;  %v92_v23 = vld [vmem:[#allocation5 + $0x30] sm:$0xff]  ;;  %v2351_v55 = vsub.s32 1, %v2317_v15  ;;  %vm968_vm9 = vcmask 654912  }
  0x61   :  { %1905 = vmatprep.mubr.msk.bf16.mxu1 %vm150_vm0, %v126_v10  ;;  %v107_v19 = vld [vmem:[#allocation5 + $0xa8] sm:$0xff]  ;;  %v120_v20 = vpack.c.bf16 %v91_v14, %v90_v13  ;;  %v93_v24 = vld [vmem:[#allocation5 + $0x38] sm:$0xff]  ;;  %v108_v25 = vld [vmem:[#allocation5 + $0xb0] sm:$0xff]  ;;  %vm975_vm10 = vcmask 720512   ;;  %vm982_vm11 = vcmask 786112   ;;  %vm3203_vm12 = vcmask 851712  }
  0x62   :  { %1888 = vmatpush3.bf16.msra.mxu0 %v1941_v1  ;;  %1924 = vmatpush3.bf16.msra.mxu1 %v1941_v1  ;;  %v128_v21 = vpack.c.bf16 %v107_v19, %v106_v18  ;;  %v109_v26 = vld [vmem:[#allocation5 + $0xb8] sm:$0xff]  ;;  %v94_v27 = vld [vmem:[#allocation5 + $0x40] sm:$0xff]  ;;  %v95_v28 = vld [vmem:[#allocation5 + $0x48] sm:$0xff]  ;;  %v121_v33 = vpack.c.bf16 %v93_v24, %v92_v23  ;;  %vm996_vm13 = vcmask 917312   ;;  %vm1003_vm14 = vcmask 982912   ;;  %s1835_s3 = sshll.u32 %s2224_s4, 4  ;;  %s1836_s3 = int_to_ptr.vmem [resolvable:$true] %s1835_s3 }
  0x63   :  { %v110_v29 = vld [vmem:[#allocation5 + $0xc0] sm:$0xff]  ;;  %v111_v30 = vld [vmem:[#allocation5 + $0xc8] sm:$0xff]  ;;  %v129_v34 = vpack.c.bf16 %v109_v26, %v108_v25  ;;  %v122_v35 = vpack.c.bf16 %v95_v28, %v94_v27  ;;  %v96_v37 = vld [vmem:[#allocation5 + $0x50] sm:$0xff]  ;;  %vm1010_vm15 = vcmask 1048512   ;;  %s2182_s30 = scalar_lea.vmem %s1836_s3, 32  ;;  %p2187_p13 = scmp.lt.s32.totalorder %s1836_s3, %s1836_s3 }
  0x64   :  { %v573_v31 = vld [vmem:[#allocation7] sm:$0x3]  ;;  %v130_v36 = vpack.c.bf16 %v111_v30, %v110_v29  ;;  %v97_v38 = vld [vmem:[#allocation5 + $0x58] sm:$0xff]  ;;  %v112_v39 = vld [vmem:[#allocation5 + $0xd0] sm:$0xff]  ;;  %p2183_p12 = scmp.ne.s32.totalorder %s1836_s3, %s2182_s30  ;;  %p2188_p0 = scmp.lt.s32.totalorder %s2182_s30, %s2182_s30 }
  0x65   :  { %1890 = vmatmul.mubr.msk.bf16.vlgmr.msra.gmra.mrb[0].mxu0 %vm150_vm0, %v119_v16  ;;  %1906 = vmatmul.mubr.msk.bf16.vlgmr.msra.gmra.mrb[0].mxu1 %vm150_vm0, %v127_v17  ;;  %v2328_v32 = vrot.slane %v573_v31, %v2321_v22  ;;  %v113_v40 = vld [vmem:[#allocation5 + $0xd8] sm:$0xff]  ;;  %v98_v41 = vld [vmem:[#allocation5 + $0x60] sm:$0xff]  ;;  %v99_v42 = vld [vmem:[#allocation5 + $0x68] sm:$0xff]  ;;  %v123_v45 = vpack.c.bf16 %v97_v38, %v96_v37  ;;  %v645_v56 = vrot.slane %v573_v31, %v2351_v55 }
  0x66   :  { %1893 = vmatprep.mubr.msk.bf16.mxu0 %vm150_vm0, %v120_v20  ;;  %1909 = vmatprep.mubr.msk.bf16.mxu1 %vm150_vm0, %v128_v21  ;;  %v114_v43 = vld [vmem:[#allocation5 + $0xe0] sm:$0xff]  ;;  %v115_v44 = vld [vmem:[#allocation5 + $0xe8] sm:$0xff]  ;;  %v131_v46 = vpack.c.bf16 %v113_v40, %v112_v39  ;;  %v124_v47 = vpack.c.bf16 %v99_v42, %v98_v41  ;;  %v100_v49 = vld [vmem:[#allocation5 + $0x70] sm:$0xff]  ;;  %p2189_p1 = por %p2188_p0, %p2187_p13 }
  0x67   :  { %584 = vbcast.lane.b32.xlu1 %v2328_v32, 264  ;;  %580 = vbcast.lane.b32.xlu0 %v2328_v32, 256  ;;  %v132_v48 = vpack.c.bf16 %v115_v44, %v114_v43  ;;  %v101_v50 = vld [vmem:[#allocation5 + $0x78] sm:$0xff]  ;;  %v116_v51 = vld [vmem:[#allocation5 + $0xf0] sm:$0xff] }
  0x68   :  { %v117_v52 = vld [vmem:[#allocation5 + $0xf8] sm:$0xff]  ;;  %v125_v53 = vpack.c.bf16 %v101_v50, %v100_v49  ;;  %v2374_v23 = vld [vmem:[#allocation10] ss:$0 sm:$0xff]  ;;  %p2190_p2 = pnand %p2189_p1, %p2183_p12 }
  0x69   :  { %v133_v54 = vpack.c.bf16 %v117_v52, %v116_v51  ;;  %v2360_v57 = vld [vmem:[#allocation2] ss:$0 sm:$0xff]  ;;  %v2362_v58 = vld [vmem:[#allocation2 + $0x1] ss:$0 sm:$0xff] }
  0x6b   :  { %588 = vbcast.lane.b32.xlu1 %v2328_v32, 272  ;;  %596 = vbcast.lane.b32.xlu0 %v2328_v32, 288 }
  0x6d   :  { %1894 = vmatmul.mubr.msk.bf16.gmra.mrb[4].mxu0 %vm150_vm0, %v121_v33  ;;  %1910 = vmatmul.mubr.msk.bf16.gmra.mrb[4].mxu1 %vm150_vm0, %v129_v34 }
  0x6e   :  { %1897 = vmatprep.mubr.msk.bf16.mxu0 %vm150_vm0, %v122_v35  ;;  %1913 = vmatprep.mubr.msk.bf16.mxu1 %vm150_vm0, %v130_v36 }
  0x6f   :  { %592 = vbcast.lane.b32.xlu1 %v2328_v32, 280  ;;  %604 = vbcast.lane.b32.xlu0 %v2328_v32, 304 }
  0x73   :  { %600 = vbcast.lane.b32.xlu1 %v2328_v32, 296  ;;  %612 = vbcast.lane.b32.xlu0 %v2328_v32, 320 }
  0x75   :  { %1898 = vmatmul.mubr.msk.bf16.gmra.mrb[8].mxu0 %vm150_vm0, %v123_v45  ;;  %1914 = vmatmul.mubr.msk.bf16.gmra.mrb[8].mxu1 %vm150_vm0, %v131_v46 }
  0x76   :  { %1901 = vmatprep.mubr.msk.bf16.mxu0 %vm150_vm0, %v124_v47  ;;  %1917 = vmatprep.mubr.msk.bf16.mxu1 %vm150_vm0, %v132_v48 }
  0x77   :  { %608 = vbcast.lane.b32.xlu1 %v2328_v32, 312  ;;  %620 = vbcast.lane.b32.xlu0 %v2328_v32, 336 }
  0x7b   :  { %616 = vbcast.lane.b32.xlu1 %v2328_v32, 328  ;;  %628 = vbcast.lane.b32.xlu0 %v2328_v32, 352 }
  0x7d   :  { %1902 = vmatmul.mubr.msk.bf16.gmra.mrb[12].mxu0 %vm150_vm0, %v125_v53  ;;  %1918 = vmatmul.mubr.msk.bf16.gmra.mrb[12].mxu1 %vm150_vm0, %v133_v54 }
  0x7f   :  { %624 = vbcast.lane.b32.xlu1 %v2328_v32, 344  ;;  %647 = vbcast.lane.b32.xlu0 %v645_v56, 256 }
  0x83   :  { %632 = vbcast.lane.b32.xlu1 %v2328_v32, 360  ;;  %655 = vbcast.lane.b32.xlu0 %v645_v56, 272 }
  0x87   :  { %651 = vbcast.lane.b32.xlu1 %v645_v56, 264  ;;  %663 = vbcast.lane.b32.xlu0 %v645_v56, 288 }
  0x8b   :  { %659 = vbcast.lane.b32.xlu1 %v645_v56, 280  ;;  %671 = vbcast.lane.b32.xlu0 %v645_v56, 304 }
  0x8f   :  { %667 = vbcast.lane.b32.xlu1 %v645_v56, 296  ;;  %679 = vbcast.lane.b32.xlu0 %v645_v56, 320 }
  0x93   :  { %675 = vbcast.lane.b32.xlu1 %v645_v56, 312  ;;  %687 = vbcast.lane.b32.xlu0 %v645_v56, 336 }
  0x97   :  { %683 = vbcast.lane.b32.xlu1 %v645_v56, 328  ;;  %695 = vbcast.lane.b32.xlu0 %v645_v56, 352 }
  0x9b   :  { %691 = vbcast.lane.b32.xlu1 %v645_v56, 344  ;;  %636 = vbcast.lane.b32.xlu0 %v2328_v32, 368 }
  0x9f   :  { %699 = vbcast.lane.b32.xlu1 %v645_v56, 360  ;;  %640 = vbcast.lane.b32.xlu0 %v2328_v32, 376 }
  0xa3   :  { %703 = vbcast.lane.b32.xlu1 %v645_v56, 368 }
  0xa7   :  { %707 = vbcast.lane.b32.xlu1 %v645_v56, 376 }
 0x138   :  { %v1891_v59 = vpop.f32.mrb[0].mxu0  ;;  %v1907_v60 = vpop.f32.mrb[0].mxu1 }
 0x139   :  { %v376_v61 = vadd.f32 %v1891_v59, %v2360_v57  ;;  %v392_v62 = vadd.f32 %v1907_v60, %v2362_v58  ;;  %v233_v63 = vpop.f32.mrb[1].mxu0  ;;  %v297_v0 = vpop.f32.mrb[1].mxu1 }
 0x13a   :  { %v374_v1 = vadd.f32 %v2360_v57, %v233_v63  ;;  %v390_v3 = vadd.f32 %v2362_v58, %v297_v0  ;;  %v1892_v4 = vpop.f32.mrb[2].mxu0  ;;  %v1908_v5 = vpop.f32.mrb[2].mxu1 }
 0x13b   :  { %1942 = vtanh.f32 %v376_v61  ;;  %v377_v6 = vadd.f32 %v1892_v4, %v2360_v57  ;;  %v236_v7 = vpop.f32.mrb[3].mxu0  ;;  %v300_v8 = vpop.f32.mrb[3].mxu1  ;;  %v393_v9 = vadd.f32 %v1908_v5, %v2362_v58 }
 0x13c   :  { %1944 = vtanh.f32 %v392_v62  ;;  %v391_v10 = vadd.f32 %v2362_v58, %v300_v8  ;;  %v375_v11 = vadd.f32 %v2360_v57, %v236_v7 }
 0x13d   :  { %1946 = vtanh.f32 %v374_v1 }
 0x13e   :  { %1948 = vtanh.f32 %v390_v3 }
 0x13f   :  { %1950 = vtanh.f32 %v377_v6 }
 0x140   :  { %1952 = vtanh.f32 %v393_v9  ;;  %v1895_v12 = vpop.f32.mrb[4].mxu0  ;;  %v1911_v13 = vpop.f32.mrb[4].mxu1 }
 0x141   :  { %v249_v14 = vpop.f32.mrb[5].mxu0  ;;  %v313_v16 = vpop.f32.mrb[5].mxu1  ;;  %v380_v17 = vadd.f32 %v1895_v12, %v2360_v57  ;;  %1954 = vtanh.f32 %v391_v10  ;;  %v396_v28 = vadd.f32 %v1911_v13, %v2362_v58 }
 0x142   :  { %v1896_v18 = vpop.f32.mrb[6].mxu0  ;;  %v1912_v19 = vpop.f32.mrb[6].mxu1  ;;  %1956 = vtanh.f32 %v375_v11  ;;  %v378_v49 = vadd.f32 %v2360_v57, %v249_v14  ;;  %v394_v61 = vadd.f32 %v2362_v58, %v313_v16 }
 0x143   :  { %v381_v20 = vadd.f32 %v1896_v18, %v2360_v57  ;;  %v252_v21 = vpop.f32.mrb[7].mxu0  ;;  %v316_v24 = vpop.f32.mrb[7].mxu1  ;;  %v397_v26 = vadd.f32 %v1912_v19, %v2362_v58 }
 0x144   :  { %v379_v45 = vadd.f32 %v2360_v57, %v252_v21  ;;  %v395_v59 = vadd.f32 %v2362_v58, %v316_v24 }
 0x145   :  { %v1943_v25 = vpop.eup %1942  ;;  %1958 = vtanh.f32 %v381_v20 }
 0x146   :  { %v1945_v27 = vpop.eup %1944  ;;  %1960 = vtanh.f32 %v380_v17  ;;  %v447_v29 = vmul.f32 %v1943_v25, %v2374_v23 }
 0x147   :  { %v1947_v30 = vpop.eup %1946  ;;  %v463_v31 = vmul.f32 %v1945_v27, %v2374_v23  ;;  %1962 = vtanh.f32 %v397_v26 }
 0x148   :  { %v1949_v32 = vpop.eup %1948  ;;  %v483_v33 = vsel %vm150_vm0, %v447_v29, 0.0  ;;  %v445_v34 = vmul.f32 %v1947_v30, %v2374_v23  ;;  %v1899_v35 = vpop.f32.mrb[8].mxu0  ;;  %1964 = vtanh.f32 %v396_v28  ;;  %v2223_v29 = vmov 0  }
 0x149   :  { %v1915_v36 = vpop.f32.mrb[8].mxu1  ;;  %v1951_v37 = vpop.eup %1950  ;;  %v531_v38 = vsel %vm150_vm0, %v463_v31, 0.0  ;;  %484 = vadd.xlane.f32.xlu1 %v483_v33  ;;  %v461_v53 = vmul.f32 %v1949_v32, %v2374_v23  ;;  %1966 = vtanh.f32 %v379_v45  ;;  %v384_v8 = vadd.f32 %v1899_v35, %v2360_v57  ;;  %1939 = vset.pattern.permute.xlu0 %v2223_v29 }
 0x14a   :  { %v2383_v39 = vpop.f32.mrb[9].mxu0  ;;  %v2385_v40 = vpop.f32.mrb[9].mxu1  ;;  %532 = vadd.xlane.f32.xlu0 %v531_v38  ;;  %v448_v42 = vmul.f32 %v1951_v37, %v2374_v23  ;;  %v477_v46 = vsel %vm150_vm0, %v445_v34, 0.0  ;;  %1968 = vtanh.f32 %v378_v49  ;;  %v400_v21 = vadd.f32 %v1915_v36, %v2362_v58  ;;  %1938 = vset.pattern.permute.xlu1 %v2223_v29 }
 0x14b   :  { %v1953_v41 = vpop.eup %1952  ;;  %v1900_v43 = vpop.f32.mrb[10].mxu0  ;;  %v525_v3 = vsel %vm150_vm0, %v461_v53, 0.0  ;;  %1970 = vtanh.f32 %v395_v59  ;;  %v382_v34 = vadd.f32 %v2360_v57, %v2383_v39 }
 0x14c   :  { %v1916_v44 = vpop.f32.mrb[10].mxu1  ;;  %v268_v47 = vpop.f32.mrb[11].mxu0  ;;  %v486_v50 = vsel %vm150_vm0, %v448_v42, 0.0  ;;  %v464_v51 = vmul.f32 %v1953_v41, %v2374_v23  ;;  %v385_v5 = vadd.f32 %v1900_v43, %v2360_v57  ;;  %1972 = vtanh.f32 %v394_v61 }
 0x14d   :  { %v2390_v48 = vpop.f32.mrb[11].mxu1  ;;  %v1955_v52 = vpop.eup %1954  ;;  %487 = vadd.xlane.f32.xlu1 %v486_v50  ;;  %v401_v20 = vadd.f32 %v1916_v44, %v2362_v58  ;;  %v383_v32 = vadd.f32 %v2360_v57, %v268_v47  ;;  %v398_v44 = vadd.f32 %v2362_v58, %v2385_v40 }
 0x14e   :  { %v1957_v54 = vpop.eup %1956  ;;  %478 = vadd.xlane.f32.xlu0 %v477_v46  ;;  %v534_v62 = vsel %vm150_vm0, %v464_v51, 0.0  ;;  %v462_v63 = vmul.f32 %v1955_v52, %v2374_v23  ;;  %1974 = vtanh.f32 %v385_v5  ;;  %v399_v42 = vadd.f32 %v2362_v58, %v2390_v48 }
 0x14f   :  { %v1959_v56 = vpop.eup %1958  ;;  %v446_v4 = vmul.f32 %v1957_v54, %v2374_v23  ;;  %1976 = vtanh.f32 %v384_v8 }
 0x150   :  { %v1961_v60 = vpop.eup %1960  ;;  %v2400_v0 = vpop.f32.mrb[12].mxu0  ;;  %v452_v9 = vmul.f32 %v1959_v56, %v2374_v23  ;;  %v528_v18 = vsel %vm150_vm0, %v462_v63, 0.0  ;;  %1978 = vtanh.f32 %v401_v20 }
 0x151   :  { %v2402_v1 = vpop.f32.mrb[12].mxu1  ;;  %535 = vadd.xlane.f32.xlu1 %v534_v62  ;;  %v2407_v6 = vpop.f32.mrb[13].mxu0  ;;  %v451_v13 = vmul.f32 %v1961_v60, %v2374_v23  ;;  %v480_v19 = vsel %vm150_vm0, %v446_v4, 0.0  ;;  %1980 = vtanh.f32 %v400_v21  ;;  %v388_v48 = vadd.f32 %v2400_v0, %v2360_v57 }
 0x152   :  { %v2409_v7 = vpop.f32.mrb[13].mxu1  ;;  %526 = vadd.xlane.f32.xlu0 %v525_v3  ;;  %v1904_v10 = vpop.f32.mrb[14].mxu0  ;;  %v498_v24 = vsel %vm150_vm0, %v452_v9, 0.0  ;;  %1982 = vtanh.f32 %v383_v32  ;;  %v404_v59 = vadd.f32 %v2402_v1, %v2362_v58  ;;  %v386_v8 = vadd.f32 %v2360_v57, %v2407_v6 }
 0x153   :  { %v2413_v11 = vpop.f32.mrb[14].mxu1  ;;  %v1963_v12 = vpop.eup %1962  ;;  %v495_v26 = vsel %vm150_vm0, %v451_v13, 0.0  ;;  %1984 = vtanh.f32 %v382_v34  ;;  %v389_v49 = vadd.f32 %v1904_v10, %v2360_v57 }
 0x154   :  { %v2416_v14 = vpop.f32.mrb[15].mxu0  ;;  %v2418_v16 = vpop.f32.mrb[15].mxu1  ;;  %v468_v25 = vmul.f32 %v1963_v12, %v2374_v23  ;;  %1986 = vtanh.f32 %v399_v42  ;;  %v405_v56 = vadd.f32 %v2413_v11, %v2362_v58 }
 0x155   :  { %v1965_v17 = vpop.eup %1964  ;;  %529 = vadd.xlane.f32.xlu1 %v528_v18  ;;  %1988 = vtanh.f32 %v398_v44  ;;  %v387_v5 = vadd.f32 %v2360_v57, %v2416_v14  ;;  %v402_v14 = vadd.f32 %v2362_v58, %v2409_v7  ;;  %v2474_v21 = vpop.permute.xlu1 %584 }
 0x156   :  { %481 = vadd.xlane.f32.xlu0 %v480_v19  ;;  %v467_v27 = vmul.f32 %v1965_v17, %v2374_v23  ;;  %v1967_v28 = vpop.eup %1966  ;;  %v546_v31 = vsel %vm150_vm0, %v468_v25, 0.0  ;;  %1990 = vtanh.f32 %v389_v49  ;;  %v403_v17 = vadd.f32 %v2362_v58, %v2418_v16 }
 0x157   :  { %v1969_v30 = vpop.eup %1968  ;;  %v450_v35 = vmul.f32 %v1967_v28, %v2374_v23  ;;  %1992 = vtanh.f32 %v388_v48 }
 0x158   :  { %v543_v33 = vsel %vm150_vm0, %v467_v27, 0.0  ;;  %v1971_v36 = vpop.eup %1970  ;;  %v449_v37 = vmul.f32 %v1969_v30, %v2374_v23  ;;  %1994 = vtanh.f32 %v405_v56 }
 0x159   :  { %499 = vadd.xlane.f32.xlu1 %v498_v24  ;;  %v1973_v38 = vpop.eup %1972  ;;  %v492_v39 = vsel %vm150_vm0, %v450_v35, 0.0  ;;  %v466_v45 = vmul.f32 %v1971_v36, %v2374_v23  ;;  %1996 = vtanh.f32 %v404_v59 }
 0x15a   :  { %496 = vadd.xlane.f32.xlu0 %v495_v26  ;;  %v1975_v41 = vpop.eup %1974  ;;  %v489_v46 = vsel %vm150_vm0, %v449_v37, 0.0  ;;  %v465_v47 = vmul.f32 %v1973_v38, %v2374_v23  ;;  %1998 = vtanh.f32 %v387_v5 }
 0x15b   :  { %v1977_v43 = vpop.eup %1976  ;;  %v456_v50 = vmul.f32 %v1975_v41, %v2374_v23  ;;  %v540_v53 = vsel %vm150_vm0, %v466_v45, 0.0  ;;  %2000 = vtanh.f32 %v386_v8 }
 0x15c   :  { %v1979_v51 = vpop.eup %1978  ;;  %v455_v40 = vmul.f32 %v1977_v43, %v2374_v23  ;;  %v537_v54 = vsel %vm150_vm0, %v465_v47, 0.0  ;;  %2002 = vtanh.f32 %v403_v17  ;;  %v581_v43 = vpop.permute.xlu0 %580 }
 0x15d   :  { %547 = vadd.xlane.f32.xlu1 %v546_v31  ;;  %v1981_v52 = vpop.eup %1980  ;;  %v510_v60 = vsel %vm150_vm0, %v456_v50, 0.0  ;;  %v472_v61 = vmul.f32 %v1979_v51, %v2374_v23  ;;  %2004 = vtanh.f32 %v402_v14  ;;  %v589_v31 = vpop.permute.xlu1 %588 }
 0x15e   :  { %544 = vadd.xlane.f32.xlu0 %v543_v33  ;;  %v507_v62 = vsel %vm150_vm0, %v455_v40, 0.0  ;;  %v471_v63 = vmul.f32 %v1981_v52, %v2374_v23  ;;  %v1983_v0 = vpop.eup %1982 }
 0x15f   :  { %v1985_v3 = vpop.eup %1984  ;;  %v558_v4 = vsel %vm150_vm0, %v472_v61, 0.0  ;;  %v454_v9 = vmul.f32 %v1983_v0, %v2374_v23 }
 0x160   :  { %v555_v1 = vsel %vm150_vm0, %v471_v63, 0.0  ;;  %v1987_v10 = vpop.eup %1986  ;;  %v453_v11 = vmul.f32 %v1985_v3, %v2374_v23  ;;  %v2495_v48 = vpop.permute.xlu0 %596 }
 0x161   :  { %493 = vadd.xlane.f32.xlu1 %v492_v39  ;;  %v1989_v12 = vpop.eup %1988  ;;  %v504_v57 = vsel %vm150_vm0, %v454_v9, 0.0  ;;  %v470_v6 = vmul.f32 %v1987_v10, %v2374_v23  ;;  %v593_v42 = vpop.permute.xlu1 %592 }
 0x162   :  { %490 = vadd.xlane.f32.xlu0 %v489_v46  ;;  %v1991_v13 = vpop.eup %1990  ;;  %v501_v19 = vsel %vm150_vm0, %v453_v11, 0.0  ;;  %v469_v20 = vmul.f32 %v1989_v12, %v2374_v23 }
 0x163   :  { %v1993_v18 = vpop.eup %1992  ;;  %v460_v24 = vmul.f32 %v1991_v13, %v2374_v23  ;;  %v552_v58 = vsel %vm150_vm0, %v470_v6, 0.0 }
 0x164   :  { %v1995_v16 = vpop.eup %1994  ;;  %v459_v25 = vmul.f32 %v1993_v18, %v2374_v23  ;;  %v549_v7 = vsel %vm150_vm0, %v469_v20, 0.0  ;;  %v605_v40 = vpop.permute.xlu0 %604 }
 0x165   :  { %541 = vadd.xlane.f32.xlu1 %v540_v53  ;;  %v1997_v26 = vpop.eup %1996  ;;  %v522_v27 = vsel %vm150_vm0, %v460_v24, 0.0  ;;  %v476_v28 = vmul.f32 %v1995_v16, %v2374_v23  ;;  %v2492_v47 = vpop.permute.xlu1 %600 }
 0x166   :  { %538 = vadd.xlane.f32.xlu0 %v537_v54  ;;  %v519_v29 = vsel %vm150_vm0, %v459_v25, 0.0  ;;  %v475_v30 = vmul.f32 %v1997_v26, %v2374_v23  ;;  %v1999_v32 = vpop.eup %1998 }
 0x167   :  { %v2001_v33 = vpop.eup %2000  ;;  %v570_v34 = vsel %vm150_vm0, %v476_v28, 0.0  ;;  %v458_v36 = vmul.f32 %v1999_v32, %v2374_v23 }
 0x168   :  { %v567_v35 = vsel %vm150_vm0, %v475_v30, 0.0  ;;  %v2003_v37 = vpop.eup %2002  ;;  %v457_v38 = vmul.f32 %v2001_v33, %v2374_v23  ;;  %v2502_v53 = vpop.permute.xlu0 %612 }
 0x169   :  { %511 = vadd.xlane.f32.xlu1 %v510_v60  ;;  %v2005_v41 = vpop.eup %2004  ;;  %v516_v44 = vsel %vm150_vm0, %v458_v36, 0.0  ;;  %v474_v39 = vmul.f32 %v2003_v37, %v2374_v23  ;;  %v2498_v51 = vpop.permute.xlu1 %608 }
 0x16a   :  { %508 = vadd.xlane.f32.xlu0 %v507_v62  ;;  %v513_v45 = vsel %vm150_vm0, %v457_v38, 0.0  ;;  %v473_v46 = vmul.f32 %v2005_v41, %v2374_v23 }
 0x16b   :  { %v564_v49 = vsel %vm150_vm0, %v474_v39, 0.0 }
 0x16c   :  { %v561_v50 = vsel %vm150_vm0, %v473_v46, 0.0  ;;  %v2506_v23 = vpop.permute.xlu0 %620  ;;  %vm1091_vm0 = vcmask 1041409  }
 0x16d   :  { %559 = vadd.xlane.f32.xlu1 %v558_v4  ;;  %v2500_v52 = vpop.permute.xlu1 %616 }
 0x16e   :  { %556 = vadd.xlane.f32.xlu0 %v555_v1 }
 0x170   :  { %v2510_v59 = vpop.permute.xlu0 %628 }
 0x171   :  { %505 = vadd.xlane.f32.xlu1 %v504_v57  ;;  %v2504_v54 = vpop.permute.xlu1 %624 }
 0x172   :  { %502 = vadd.xlane.f32.xlu0 %v501_v19 }
 0x174   :  { %v648_v61 = vpop.permute.xlu0 %647 }
 0x175   :  { %553 = vadd.xlane.f32.xlu1 %v552_v58  ;;  %v2508_v56 = vpop.permute.xlu1 %632 }
 0x176   :  { %550 = vadd.xlane.f32.xlu0 %v549_v7 }
 0x178   :  { %v656_v63 = vpop.permute.xlu0 %655 }
 0x179   :  { %523 = vadd.xlane.f32.xlu1 %v522_v27  ;;  %v652_v60 = vpop.permute.xlu1 %651 }
 0x17a   :  { %520 = vadd.xlane.f32.xlu0 %v519_v29 }
 0x17c   :  { %v664_v3 = vpop.permute.xlu0 %663 }
 0x17d   :  { %571 = vadd.xlane.f32.xlu1 %v570_v34  ;;  %v660_v62 = vpop.permute.xlu1 %659 }
 0x17e   :  { %568 = vadd.xlane.f32.xlu0 %v567_v35 }
 0x180   :  { %v672_v5 = vpop.permute.xlu0 %671 }
 0x181   :  { %517 = vadd.xlane.f32.xlu1 %v516_v44  ;;  %v668_v0 = vpop.permute.xlu1 %667 }
 0x182   :  { %514 = vadd.xlane.f32.xlu0 %v513_v45 }
 0x184   :  { %v2514_v8 = vpop.permute.xlu0 %679 }
 0x185   :  { %565 = vadd.xlane.f32.xlu1 %v564_v49  ;;  %v676_v4 = vpop.permute.xlu1 %675 }
 0x186   :  { %562 = vadd.xlane.f32.xlu0 %v561_v50 }
 0x188   :  { %v688_v10 = vpop.permute.xlu0 %687 }
 0x189   :  { %v2512_v1 = vpop.permute.xlu1 %683 }
 0x18c   :  { %v2520_v12 = vpop.permute.xlu0 %695 }
 0x18d   :  { %v2516_v9 = vpop.permute.xlu1 %691 }
 0x190   :  { %v2524_v17 = vpop.permute.xlu0 %636 }
 0x191   :  { %v2518_v11 = vpop.permute.xlu1 %699 }
 0x194   :  { %v2528_v14 = vpop.permute.xlu0 %640 }
 0x195   :  { %v2522_v13 = vpop.permute.xlu1 %703 }
 0x199   :  { %v2526_v18 = vpop.permute.xlu1 %707 }
 0x1d6   :  { %v485_v57 = vpop.xlane.xlu1 %484 }
 0x1d7   :  { %v533_v6 = vpop.xlane.xlu0 %532  ;;  %v2530_v19 = vadd.f32 %v589_v31, %v485_v57 }
 0x1d8   :  { %v2533_v24 = vadd.f32 %v656_v63, %v533_v6 }
 0x1d9   :  { %812 = vperm.xlu1 %1938, %v2530_v19  }
 0x1da   :  { %v488_v20 = vpop.xlane.xlu1 %487 }
 0x1db   :  { %v479_v16 = vpop.xlane.xlu0 %478  ;;  %v2539_v7 = vadd.f32 %v593_v42, %v488_v20 }
 0x1dc   :  { %v2535_v25 = vadd.f32 %v581_v43, %v479_v16 }
 0x1dd   :  { %860 = vperm.xlu1 %1938, %v2533_v24  }
 0x1de   :  { %806 = vperm.xlu0 %1939, %v2535_v25   ;;  %v536_v26 = vpop.xlane.xlu1 %535 }
 0x1df   :  { %v527_v58 = vpop.xlane.xlu0 %526  ;;  %v2545_v30 = vadd.f32 %v660_v62, %v536_v26 }
 0x1e0   :  { %v2541_v27 = vadd.f32 %v648_v61, %v527_v58 }
 0x1e2   :  { %815 = vperm.xlu0 %1939, %v2539_v7   ;;  %854 = vperm.xlu1 %1938, %v2541_v27   ;;  %v530_v28 = vpop.xlane.xlu1 %529 }
 0x1e3   :  { %v482_v29 = vpop.xlane.xlu0 %481  ;;  %v2552_v34 = vadd.f32 %v652_v60, %v530_v28 }
 0x1e4   :  { %v2548_v31 = vadd.f32 %v2474_v21, %v482_v29 }
 0x1e6   :  { %863 = vperm.xlu0 %1939, %v2545_v30   ;;  %809 = vperm.xlu1 %1938, %v2548_v31   ;;  %v500_v32 = vpop.xlane.xlu1 %499 }
 0x1e7   :  { %v497_v33 = vpop.xlane.xlu0 %496 }
 0x1e8   :  { %v2554_v35 = vadd.f32 %v605_v40, %v497_v33 }
 0x1ea   :  { %857 = vperm.xlu0 %1939, %v2552_v34   ;;  %824 = vperm.xlu1 %1938, %v2554_v35   ;;  %v548_v36 = vpop.xlane.xlu1 %547 }
 0x1eb   :  { %v545_v37 = vpop.xlane.xlu0 %544  ;;  %v2561_v42 = vadd.f32 %v676_v4, %v548_v36 }
 0x1ec   :  { %v2558_v38 = vadd.f32 %v672_v5, %v545_v37 }
 0x1ee   :  { %872 = vperm.xlu0 %1939, %v2558_v38   ;;  %v494_v21 = vpop.xlane.xlu1 %493 }
 0x1ef   :  { %v491_v41 = vpop.xlane.xlu0 %490  ;;  %v2569_v45 = vadd.f32 %v2492_v47, %v494_v21 }
 0x1f0   :  { %v2564_v43 = vadd.f32 %v2495_v48, %v491_v41  ;;  %v2576_v48 = vadd.f32 %v2498_v51, %v500_v32 }
 0x1f2   :  { %875 = vperm.xlu0 %1939, %v2561_v42   ;;  %818 = vperm.xlu1 %1938, %v2564_v43   ;;  %v542_v44 = vpop.xlane.xlu1 %541 }
 0x1f3   :  { %v539_v39 = vpop.xlane.xlu0 %538  ;;  %v2578_v40 = vadd.f32 %v668_v0, %v542_v44 }
 0x1f4   :  { %v2571_v46 = vadd.f32 %v664_v3, %v539_v39 }
 0x1f6   :  { %821 = vperm.xlu0 %1939, %v2569_v45   ;;  %866 = vperm.xlu1 %1938, %v2571_v46   ;;  %v512_v49 = vpop.xlane.xlu1 %511 }
 0x1f7   :  { %v509_v50 = vpop.xlane.xlu0 %508  ;;  %v2594_v5 = vadd.f32 %v2504_v54, %v512_v49 }
 0x1f8   :  { %v2583_v61 = vadd.f32 %v2506_v23, %v509_v50 }
 0x1f9   :  { %3221 = vst [vmem:[#allocation17_spill] sm:$0xff] %v2594_v5 }
 0x1fa   :  { %869 = vperm.xlu0 %1939, %v2578_v40   ;;  %827 = vperm.xlu1 %1938, %v2576_v48   ;;  %v560_v60 = vpop.xlane.xlu1 %559  ;;  %3220 = vst [vmem:[#allocation16_spill] sm:$0xff] %v2583_v61 }
 0x1fb   :  { %v557_v47 = vpop.xlane.xlu0 %556  ;;  %v2602_v6 = vadd.f32 %v2516_v9, %v560_v60  ;;  %v2656_v60 = vand.u32 127, %v575_v2 }
 0x1fc   :  { %v2585_v62 = vadd.f32 %v688_v10, %v557_v47 }
 0x1fd   :  { %v928_v2 = vadd.s32 4294967264, %v2656_v60 }
 0x1fe   :  { %884 = vperm.xlu0 %1939, %v2585_v62   ;;  %836 = vperm.xlu1 %1938, %v2583_v61   ;;  %v506_v63 = vpop.xlane.xlu1 %505 }
 0x1ff   :  { %v503_v51 = vpop.xlane.xlu0 %502 }
 0x200   :  { %v2590_v0 = vadd.f32 %v2502_v53, %v503_v51  ;;  %v2605_v53 = vadd.f32 %v2500_v52, %v506_v63  ;;  %v907_v63 = vadd.s32 4294967288, %v2656_v60 }
 0x202   :  { %830 = vperm.xlu1 %1938, %v2590_v0   ;;  %v554_v3 = vpop.xlane.xlu1 %553  ;;  %3222 = vst [vmem:[#allocation18_spill] sm:$0xff] %v2605_v53 }
 0x203   :  { %v551_v4 = vpop.xlane.xlu0 %550 }
 0x204   :  { %v2597_v23 = vadd.f32 %v2514_v8, %v551_v4  ;;  %v2610_v8 = vadd.f32 %v2512_v1, %v554_v3  ;;  %v2664_v4 = vsub.s32 %v907_v63, %v2317_v15  ;;  %v935_v63 = vadd.s32 4294967256, %v2656_v60 }
 0x206   :  { %878 = vperm.xlu0 %1939, %v2597_v23   ;;  %839 = vperm.xlu1 %1938, %v2594_v5   ;;  %v524_v10 = vpop.xlane.xlu1 %523  ;;  %3227 = vst [vmem:[#allocation23_spill] sm:$0xff] %v2664_v4  ;;  %v949_v5 = vadd.s32 4294967240, %v2656_v60 }
 0x207   :  { %v521_v57 = vpop.xlane.xlu0 %520 }
 0x208   :  { %v2613_v16 = vadd.f32 %v2524_v17, %v521_v57  ;;  %v2669_v57 = vsub.s32 %v2656_v60, %v2317_v15 }
 0x20a   :  { %887 = vperm.xlu0 %1939, %v2602_v6   ;;  %833 = vperm.xlu1 %1938, %v2605_v53   ;;  %v572_v54 = vpop.xlane.xlu1 %571  ;;  %3223 = vst [vmem:[#allocation19_spill] sm:$0xff] %v2613_v16  ;;  %3228 = vst [vmem:[#allocation24_spill] sm:$0xff] %v2669_v57 }
 0x20b   :  { %v569_v20 = vpop.xlane.xlu0 %568 }
 0x20c   :  { %v2618_v52 = vadd.f32 %v2522_v13, %v569_v20  ;;  %v2634_v13 = vadd.f32 %v2528_v14, %v524_v10  ;;  %v914_v10 = vadd.s32 4294967280, %v2656_v60 }
 0x20e   :  { %881 = vperm.xlu0 %1939, %v2610_v8   ;;  %848 = vperm.xlu1 %1938, %v2613_v16   ;;  %v518_v26 = vpop.xlane.xlu1 %517  ;;  %3226 = vst [vmem:[#allocation22_spill] sm:$0xff] %v2634_v13 }
 0x20f   :  { %v515_v9 = vpop.xlane.xlu0 %514  ;;  %v2626_v17 = vadd.f32 %v2508_v56, %v518_v26  ;;  %v2642_v56 = vadd.f32 %v2526_v18, %v572_v54  ;;  %v921_v26 = vadd.s32 4294967272, %v2656_v60 }
 0x210   :  { %v2621_v58 = vadd.f32 %v2510_v59, %v515_v9 }
 0x211   :  { %3225 = vst [vmem:[#allocation21_spill] sm:$0xff] %v2626_v17 }
 0x212   :  { %3224 = vst [vmem:[#allocation20_spill] sm:$0xff] %v2621_v58  ;;  %896 = vperm.xlu0 %1939, %v2618_v52   ;;  %842 = vperm.xlu1 %1938, %v2621_v58   ;;  %v566_v29 = vpop.xlane.xlu1 %565 }
 0x213   :  { %v563_v1 = vpop.xlane.xlu0 %562  ;;  %v2637_v59 = vadd.f32 %v2518_v11, %v566_v29 }
 0x214   :  { %v2629_v28 = vadd.f32 %v2520_v12, %v563_v1 }
 0x216   :  { %890 = vperm.xlu0 %1939, %v2629_v28   ;;  %845 = vperm.xlu1 %1938, %v2626_v17   ;;  %v942_v17 = vadd.s32 4294967248, %v2656_v60 }
 0x218   :  { %v2707_v53 = vsub.s32 %v942_v17, %v2317_v15 }
 0x21a   :  { %851 = vperm.xlu1 %1938, %v2634_v13   ;;  %893 = vperm.xlu0 %1939, %v2637_v59   ;;  %v2682_v13 = vsub.s32 %v914_v10, %v2317_v15  ;;  %v2695_v10 = vsub.s32 %v921_v26, %v2317_v15 }
 0x21e   :  { %899 = vperm.xlu0 %1939, %v2642_v56  }
 0x258   :  { %v813_v12 = vpop.permute.xlu1 %812 }
 0x25c   :  { %v861_v32 = vpop.permute.xlu1 %860 }
 0x25d   :  { %v807_v33 = vpop.permute.xlu0 %806  ;;  %v1024_v58 = vrot.slane %v861_v32, %v2682_v13 }
 0x261   :  { %v2645_v36 = vpop.permute.xlu0 %815  ;;  %v855_v37 = vpop.permute.xlu1 %854 }
 0x262   :  { %v1015_v1 = vrot.slane %v855_v37, %v2669_v57  ;;  %v2690_v37 = vsub.s32 %v928_v2, %v2317_v15  ;;  %v956_v2 = vadd.s32 4294967232, %v2656_v60 }
 0x265   :  { %v864_v14 = vpop.permute.xlu0 %863  ;;  %v810_v21 = vpop.permute.xlu1 %809 }
 0x266   :  { %v911_v29 = vrot.slane %v810_v21, %v2664_v4  ;;  %v1029_v61 = vrot.slane %v864_v14, %v2695_v10  ;;  %v925_v14 = vrot.slane %v2645_v36, %v2695_v10 }
 0x269   :  { %v858_v41 = vpop.permute.xlu0 %857  ;;  %v2647_v11 = vpop.permute.xlu1 %824 }
 0x26a   :  { %v1019_v54 = vrot.slane %v858_v41, %v2664_v4  ;;  %v906_v41 = vrot.slane %v807_v33, %v2669_v57 }
 0x26c   :  { %v1020_v16 = vsel %vm912_vm1, %v1019_v54, %v1015_v1  ;;  %v913_v33 = vsel %vm912_vm1, %v911_v29, %v906_v41  ;;  %v2699_v54 = vsub.s32 %v935_v63, %v2317_v15  ;;  %v918_v1 = vrot.slane %v813_v12, %v2682_v13 }
 0x26d   :  { %v2649_v44 = vpop.permute.xlu0 %872  ;;  %v1025_v32 = vsel %vm919_vm2, %v1024_v58, %v1020_v16  ;;  %v963_v29 = vadd.s32 4294967224, %v2656_v60  ;;  %v2713_v41 = vsub.s32 %v949_v5, %v2317_v15  ;;  %v2725_v5 = vsub.s32 %v956_v2, %v2317_v15 }
 0x26e   :  { %v920_v63 = vsel %vm919_vm2, %v918_v1, %v913_v33  ;;  %v970_v1 = vadd.s32 4294967216, %v2656_v60 }
 0x26f   :  { %v2730_v36 = vsub.s32 %v963_v29, %v2317_v15  ;;  %v984_v29 = vadd.s32 4294967200, %v2656_v60 }
 0x271   :  { %v2651_v39 = vpop.permute.xlu0 %875  ;;  %v819_v49 = vpop.permute.xlu1 %818  ;;  %3229 = vst [vmem:[#allocation25_spill] sm:$0xff] %v2730_v36 }
 0x272   :  { %v932_v16 = vrot.slane %v819_v49, %v2690_v37  ;;  %v927_v49 = vsel %vm3219_vm3, %v925_v14, %v920_v63  ;;  %v977_v63 = vadd.s32 4294967208, %v2656_v60 }
 0x275   :  { %v2653_v18 = vpop.permute.xlu0 %821  ;;  %v867_v50 = vpop.permute.xlu1 %866 }
 0x276   :  { %v1034_v57 = vrot.slane %v867_v50, %v2690_v37  ;;  %v939_v17 = vrot.slane %v2653_v18, %v2699_v54  ;;  %v1030_v50 = vsel %vm3219_vm3, %v1029_v61, %v1025_v32  ;;  %v1044_v18 = vrot.slane %v2649_v44, %v2707_v53 }
 0x277   :  { %v934_v61 = vsel %vm933_vm4, %v932_v16, %v927_v49  ;;  %v946_v44 = vrot.slane %v2647_v11, %v2707_v53  ;;  %v991_v49 = vadd.s32 4294967192, %v2656_v60  ;;  %v2756_v11 = vsub.s32 %v970_v1, %v2317_v15 }
 0x278   :  { %v941_v2 = vsel %vm940_vm5, %v939_v17, %v934_v61  ;;  %v1049_v17 = vrot.slane %v2651_v39, %v2713_v41  ;;  %v2761_v39 = vsub.s32 %v977_v63, %v2317_v15 }
 0x279   :  { %v2658_v47 = vpop.permute.xlu1 %827  ;;  %v870_v51 = vpop.permute.xlu0 %869  ;;  %v948_v61 = vsel %vm947_vm6, %v946_v44, %v941_v2  ;;  %v2766_v2 = vsub.s32 %v984_v29, %v2317_v15 }
 0x27a   :  { %v1039_v26 = vrot.slane %v870_v51, %v2699_v54  ;;  %v1035_v51 = vsel %vm933_vm4, %v1034_v57, %v1030_v50 }
 0x27c   :  { %v1040_v33 = vsel %vm940_vm5, %v1039_v26, %v1035_v51  ;;  %v953_v26 = vrot.slane %v2658_v47, %v2713_v41 }
 0x27d   :  { %v2661_v3 = vpop.permute.xlu1 %836  ;;  %v2673_v20 = vpop.permute.xlu0 %884  ;;  %v1045_v16 = vsel %vm947_vm6, %v1044_v18, %v1040_v33 }
 0x27e   :  { %v1064_v63 = vrot.slane %v2673_v20, %v2756_v11 }
 0x281   :  { %v2675_v9 = vpop.permute.xlu1 %830 }
 0x282   :  { %v960_v14 = vrot.slane %v2675_v9, %v2725_v5  ;;  %v955_v9 = vsel %vm954_vm7, %v953_v26, %v948_v61  ;;  %v1005_v26 = vadd.s32 4294967176, %v2656_v60 }
 0x284   :  { %v2789_v61 = vsub.s32 %v1005_v26, %v2317_v15 }
 0x285   :  { %v879_v21 = vpop.permute.xlu0 %878  ;;  %v2692_v4 = vpop.permute.xlu1 %839 }
 0x286   :  { %v1054_v50 = vrot.slane %v879_v21, %v2725_v5  ;;  %v1050_v21 = vsel %vm954_vm7, %v1049_v17, %v1045_v16  ;;  %v974_v16 = vrot.slane %v2661_v3, %v2756_v11  ;;  %v981_v20 = vrot.slane %v2692_v4, %v2761_v39 }
 0x289   :  { %v2716_v58 = vpop.permute.xlu0 %887  ;;  %v834_v12 = vpop.permute.xlu1 %833 }
 0x28a   :  { %v967_v51 = vrot.slane %v834_v12, %v2730_v36  ;;  %v962_v12 = vsel %vm961_vm8, %v960_v14, %v955_v9  ;;  %v998_v14 = vadd.s32 4294967184, %v2656_v60  ;;  %v1069_v3 = vrot.slane %v2716_v58, %v2761_v39 }
 0x28c   :  { %v969_v1 = vsel %vm968_vm9, %v967_v51, %v962_v12  ;;  %v2792_v9 = vsub.s32 %v998_v14, %v2317_v15 }
 0x28d   :  { %v882_v57 = vpop.permute.xlu0 %881  ;;  %v2736_v32 = vpop.permute.xlu1 %848  ;;  %v976_v17 = vsel %vm975_vm10, %v974_v16, %v969_v1 }
 0x28e   :  { %v1059_v47 = vrot.slane %v882_v57, %v2730_v36  ;;  %v1055_v57 = vsel %vm961_vm8, %v1054_v50, %v1050_v21  ;;  %v2771_v36 = vsub.s32 %v991_v49, %v2317_v15 }
 0x290   :  { %v1060_v44 = vsel %vm968_vm9, %v1059_v47, %v1055_v57 }
 0x291   :  { %v897_v33 = vpop.permute.xlu0 %896  ;;  %v843_v18 = vpop.permute.xlu1 %842  ;;  %v1065_v51 = vsel %vm975_vm10, %v1064_v63, %v1060_v44  ;;  %v1002_v63 = vrot.slane %v2736_v32, %v2792_v9 }
 0x292   :  { %v988_v47 = vrot.slane %v843_v18, %v2766_v2  ;;  %v983_v18 = vsel %vm982_vm11, %v981_v20, %v976_v17  ;;  %v1070_v57 = vsel %vm982_vm11, %v1069_v3, %v1065_v51  ;;  %v1084_v16 = vrot.slane %v897_v33, %v2792_v9 }
 0x294   :  { %v990_v1 = vsel %vm3203_vm12, %v988_v47, %v983_v18 }
 0x295   :  { %v891_v50 = vpop.permute.xlu0 %890  ;;  %v846_v29 = vpop.permute.xlu1 %845 }
 0x296   :  { %v1074_v49 = vrot.slane %v891_v50, %v2766_v2  ;;  %v995_v60 = vrot.slane %v846_v29, %v2771_v36 }
 0x298   :  { %v1075_v58 = vsel %vm3203_vm12, %v1074_v49, %v1070_v57  ;;  %v997_v44 = vsel %vm996_vm13, %v995_v60, %v990_v1  ;;  %vm1094_vm12 = vcmask 1041408  }
 0x299   :  { %v894_v21 = vpop.permute.xlu0 %893  ;;  %v852_v12 = vpop.permute.xlu1 %851  ;;  %v1004_v29 = vsel %vm1003_vm14, %v1002_v63, %v997_v44 }
 0x29a   :  { %v1079_v4 = vrot.slane %v894_v21, %v2771_v36  ;;  %v1009_v15 = vrot.slane %v852_v12, %v2789_v61 }
 0x29c   :  { %v1080_v26 = vsel %vm996_vm13, %v1079_v4, %v1075_v58  ;;  %v1011_v51 = vsel %vm1010_vm15, %v1009_v15, %v1004_v29 }
 0x29d   :  { %v900_v14 = vpop.permute.xlu0 %899  ;;  %v1085_v17 = vsel %vm1003_vm14, %v1084_v16, %v1080_v26 }
 0x29e   :  { %v1089_v50 = vrot.slane %v900_v14, %v2789_v61 }
 0x2a0   :  { %v1090_v47 = vsel %vm1010_vm15, %v1089_v50, %v1085_v17 }
 0x2a1   :  { %v1092_v49 = vsel %vm1091_vm0, %v1090_v47, %v1011_v51 }
 0x2a2   :  { %v1095_v32 = vsel %vm1094_vm12, %v1092_v49, -inf }
 0x2a3   :  { %1096 = vmax.xlane.f32.xlu1 %v1095_v32 }
 0x330   :  { %v1097_v33 = vpop.xlane.xlu1 %1096 }
 0x331   :  { %v2813_v20 = vrot.slane %v1097_v33, %v2321_v22  ;;  %v2816_v3 = vrot.slane %v1097_v33, %v2351_v55 }
 0x333   :  { %v1125_v60 = vsub.f32 %v2541_v27, %v2816_v3  ;;  %v1109_v21 = vsub.f32 %v2535_v25, %v2813_v20  ;;  %v1131_v12 = vsub.f32 %v2558_v38, %v2816_v3  ;;  %v1110_v18 = vsub.f32 %v2548_v31, %v2813_v20 }
 0x334   :  { %v1133_v58 = vsub.f32 %v2597_v23, %v2816_v3  ;;  %v1111_v27 = vsub.f32 %v2530_v19, %v2813_v20  ;;  %v1134_v38 = vsub.f32 %v2610_v8, %v2816_v3  ;;  %v1112_v31 = vsub.f32 %v2539_v7, %v2813_v20 }
 0x335   :  { %v1173_v57 = vmul.f32 1.442695, %v1125_v60  ;;  %v1141_v4 = vmul.f32 1.442695, %v1109_v21  ;;  %v1185_v1 = vmul.f32 1.442695, %v1131_v12  ;;  %v1135_v23 = vsub.f32 %v2585_v62, %v2816_v3 }
 0x336   :  { %v1143_v44 = vmul.f32 1.442695, %v1110_v18  ;;  %v1189_v25 = vmul.f32 1.442695, %v1133_v58  ;;  %v1145_v26 = vmul.f32 1.442695, %v1111_v27  ;;  %v1113_v19 = vsub.f32 %v2564_v43, %v2813_v20 }
 0x337   :  { %2006 = vpow2.f32 %v1173_v57  ;;  %v1191_v15 = vmul.f32 1.442695, %v1134_v38  ;;  %v1147_v63 = vmul.f32 1.442695, %v1112_v31  ;;  %v1193_v7 = vmul.f32 1.442695, %v1135_v23 }
 0x338   :  { %2008 = vpow2.f32 %v1141_v4  ;;  %v1136_v8 = vsub.f32 %v2602_v6, %v2816_v3  ;;  %v1149_v62 = vmul.f32 1.442695, %v1113_v19  ;;  %v1114_v50 = vsub.f32 %v2569_v45, %v2813_v20 }
 0x339   :  { %2010 = vpow2.f32 %v1185_v1  ;;  %v1137_v51 = vsub.f32 %v2629_v28, %v2816_v3  ;;  %v1115_v47 = vsub.f32 %v2554_v35, %v2813_v20  ;;  %v1138_v33 = vsub.f32 %v2637_v59, %v2816_v3 }
 0x33a   :  { %2012 = vpow2.f32 %v1143_v44  ;;  %v1195_v17 = vmul.f32 1.442695, %v1136_v8  ;;  %v1151_v6 = vmul.f32 1.442695, %v1114_v50  ;;  %v1116_v60 = vsub.f32 %v2576_v48, %v2813_v20 }
 0x33b   :  { %2014 = vpow2.f32 %v1189_v25  ;;  %v1197_v32 = vmul.f32 1.442695, %v1137_v51  ;;  %v1153_v28 = vmul.f32 1.442695, %v1115_v47  ;;  %v1199_v12 = vmul.f32 1.442695, %v1138_v33 }
 0x33c   :  { %2016 = vpow2.f32 %v1145_v26  ;;  %v1139_v18 = vsub.f32 %v2618_v52, %v2816_v3  ;;  %v1155_v59 = vmul.f32 1.442695, %v1116_v60  ;;  %v1117_v57 = vsub.f32 %v2590_v0, %v2813_v20  ;;  %v3236_v60 = vld [vmem:[#allocation16_spill] sm:$0xff] }
 0x33d   :  { %2018 = vpow2.f32 %v1191_v15  ;;  %v1140_v58 = vsub.f32 %v2642_v56, %v2816_v3  ;;  %v1126_v44 = vsub.f32 %v2552_v34, %v2816_v3  ;;  %v1127_v56 = vsub.f32 %v2533_v24, %v2816_v3 }
 0x33e   :  { %2020 = vpow2.f32 %v1147_v63  ;;  %v1201_v1 = vmul.f32 1.442695, %v1139_v18  ;;  %v1157_v52 = vmul.f32 1.442695, %v1117_v57  ;;  %v1128_v15 = vsub.f32 %v2545_v30, %v2816_v3 }
 0x33f   :  { %2022 = vpow2.f32 %v1193_v7  ;;  %v1203_v25 = vmul.f32 1.442695, %v1140_v58  ;;  %v1175_v38 = vmul.f32 1.442695, %v1126_v44  ;;  %v1177_v34 = vmul.f32 1.442695, %v1127_v56 }
 0x340   :  { %2024 = vpow2.f32 %v1149_v62  ;;  %v1179_v24 = vmul.f32 1.442695, %v1128_v15  ;;  %v1129_v19 = vsub.f32 %v2571_v46, %v2816_v3  ;;  %v1130_v62 = vsub.f32 %v2578_v40, %v2816_v3  ;;  %v3234_v40 = vld [vmem:[#allocation18_spill] sm:$0xff]  ;;  %v3239_v58 = vld [vmem:[#allocation20_spill] sm:$0xff] }
 0x341   :  { %v2838_v16 = vpop.eup %2006  ;;  %2026 = vpow2.f32 %v1195_v17  ;;  %v1132_v51 = vsub.f32 %v2561_v42, %v2816_v3  ;;  %v3237_v3 = vld [vmem:[#allocation17_spill] sm:$0xff] }
 0x342   :  { %3230 = vst [vmem:[#allocation26_spill] sm:$0xff] %v2838_v16  ;;  %v2840_v14 = vpop.eup %2008  ;;  %1286 = vperm.xlu1 %1938, %v2838_v16   ;;  %2028 = vpow2.f32 %v1151_v6  ;;  %v1181_v30 = vmul.f32 1.442695, %v1129_v19  ;;  %v1183_v46 = vmul.f32 1.442695, %v1130_v62 }
 0x343   :  { %1238 = vperm.xlu0 %1939, %v2840_v14   ;;  %v2848_v29 = vpop.eup %2010  ;;  %2030 = vpow2.f32 %v1197_v32  ;;  %v1187_v47 = vmul.f32 1.442695, %v1132_v51  ;;  %v1118_v32 = vsub.f32 %v3234_v40, %v2813_v20 }
 0x344   :  { %v2850_v43 = vpop.eup %2012  ;;  %2032 = vpow2.f32 %v1153_v28 }
 0x345   :  { %v2858_v49 = vpop.eup %2014  ;;  %2034 = vpow2.f32 %v1199_v12  ;;  %v1159_v28 = vmul.f32 1.442695, %v1118_v32  ;;  %v1119_v12 = vsub.f32 %v3236_v60, %v2813_v20 }
 0x346   :  { %1304 = vperm.xlu1 %1938, %v2848_v29   ;;  %v2860_v45 = vpop.eup %2016  ;;  %2036 = vpow2.f32 %v1155_v59  ;;  %v1120_v59 = vsub.f32 %v3237_v3, %v2813_v20  ;;  %v3250_v3 = vld [vmem:[#allocation24_spill] sm:$0xff] }
 0x347   :  { %1241 = vperm.xlu0 %1939, %v2850_v43   ;;  %v2868_v21 = vpop.eup %2018  ;;  %2038 = vpow2.f32 %v1201_v1  ;;  %v1161_v42 = vmul.f32 1.442695, %v1119_v12 }
 0x348   :  { %3231 = vst [vmem:[#allocation27_spill] sm:$0xff] %v2868_v21  ;;  %v2870_v35 = vpop.eup %2020  ;;  %2040 = vpow2.f32 %v1157_v52  ;;  %v1163_v1 = vmul.f32 1.442695, %v1120_v59  ;;  %v1121_v52 = vsub.f32 %v3239_v58, %v2813_v20 }
 0x349   :  { %v2878_v4 = vpop.eup %2022  ;;  %2042 = vpow2.f32 %v1203_v25 }
 0x34a   :  { %1310 = vperm.xlu1 %1938, %v2858_v49   ;;  %v2880_v48 = vpop.eup %2024  ;;  %2044 = vpow2.f32 %v1175_v38  ;;  %v1165_v25 = vmul.f32 1.442695, %v1121_v52  ;;  %v3241_v38 = vld [vmem:[#allocation21_spill] sm:$0xff] }
 0x34b   :  { %1244 = vperm.xlu0 %1939, %v2860_v45   ;;  %v2888_v27 = vpop.eup %2026  ;;  %2046 = vpow2.f32 %v1177_v34  ;;  %v1122_v56 = vsub.f32 %v3241_v38, %v2813_v20 }
 0x34c   :  { %v2890_v0 = vpop.eup %2028  ;;  %2048 = vpow2.f32 %v1179_v24  ;;  %v3242_v24 = vld [vmem:[#allocation19_spill] sm:$0xff] }
 0x34d   :  { %v2896_v26 = vpop.eup %2030  ;;  %2050 = vpow2.f32 %v1181_v30  ;;  %v1167_v15 = vmul.f32 1.442695, %v1122_v56  ;;  %v1123_v19 = vsub.f32 %v3242_v24, %v2813_v20 }
 0x34e   :  { %1313 = vperm.xlu1 %1938, %v2868_v21   ;;  %v2898_v31 = vpop.eup %2032  ;;  %2052 = vpow2.f32 %v1183_v46  ;;  %v3244_v46 = vld [vmem:[#allocation22_spill] sm:$0xff] }
 0x34f   :  { %1247 = vperm.xlu0 %1939, %v2870_v35   ;;  %v2904_v23 = vpop.eup %2034  ;;  %2054 = vpow2.f32 %v1187_v47  ;;  %v1169_v62 = vmul.f32 1.442695, %v1123_v19  ;;  %v1124_v51 = vsub.f32 %v3244_v46, %v2813_v20 }
 0x350   :  { %v2906_v63 = vpop.eup %2036  ;;  %2056 = vpow2.f32 %v1159_v28 }
 0x351   :  { %v2912_v7 = vpop.eup %2038  ;;  %2058 = vpow2.f32 %v1161_v42  ;;  %v1171_v40 = vmul.f32 1.442695, %v1124_v51 }
 0x352   :  { %1316 = vperm.xlu1 %1938, %v2878_v4   ;;  %v2914_v8 = vpop.eup %2040  ;;  %2060 = vpow2.f32 %v1163_v1  ;;  %v3251_v1 = vld [vmem:[#allocation23_spill] sm:$0xff] }
 0x353   :  { %1250 = vperm.xlu0 %1939, %v2880_v48   ;;  %v2920_v50 = vpop.eup %2042  ;;  %2062 = vpow2.f32 %v1165_v25 }
 0x354   :  { %v2922_v17 = vpop.eup %2044  ;;  %2064 = vpow2.f32 %v1167_v15 }
 0x355   :  { %3232 = vst [vmem:[#allocation28_spill] sm:$0xff] %v2922_v17  ;;  %v2928_v6 = vpop.eup %2046  ;;  %2066 = vpow2.f32 %v1169_v62 }
 0x356   :  { %1319 = vperm.xlu1 %1938, %v2888_v27   ;;  %3233 = vst [vmem:[#allocation29_spill] sm:$0xff] %v2928_v6  ;;  %v2933_v33 = vpop.eup %2048  ;;  %2068 = vpow2.f32 %v1171_v40 }
 0x357   :  { %1253 = vperm.xlu0 %1939, %v2890_v0   ;;  %3235 = vst [vmem:[#allocation18_spill] sm:$0xff] %v2933_v33  ;;  %v2938_v18 = vpop.eup %2050 }
 0x358   :  { %v2943_v57 = vpop.eup %2052 }
 0x359   :  { %3238 = vst [vmem:[#allocation16_spill] sm:$0xff] %v2943_v57  ;;  %v2948_v44 = vpop.eup %2054 }
 0x35a   :  { %1322 = vperm.xlu1 %1938, %v2896_v26   ;;  %3240 = vst [vmem:[#allocation17_spill] sm:$0xff] %v2948_v44  ;;  %v2953_v34 = vpop.eup %2056 }
 0x35b   :  { %1256 = vperm.xlu0 %1939, %v2898_v31   ;;  %v2958_v30 = vpop.eup %2058 }
 0x35c   :  { %3243 = vst [vmem:[#allocation20_spill] sm:$0xff] %v2958_v30  ;;  %v2963_v47 = vpop.eup %2060 }
 0x35d   :  { %3245 = vst [vmem:[#allocation21_spill] sm:$0xff] %v2963_v47  ;;  %v2966_v32 = vpop.eup %2062 }
 0x35e   :  { %1325 = vperm.xlu1 %1938, %v2904_v23   ;;  %3246 = vst [vmem:[#allocation19_spill] sm:$0xff] %v2966_v32  ;;  %v2969_v28 = vpop.eup %2064 }
 0x35f   :  { %1259 = vperm.xlu0 %1939, %v2906_v63   ;;  %3247 = vst [vmem:[#allocation22_spill] sm:$0xff] %v2969_v28  ;;  %v2972_v60 = vpop.eup %2066 }
 0x360   :  { %3248 = vst [vmem:[#allocation30_spill] sm:$0xff] %v2972_v60  ;;  %v2975_v20 = vpop.eup %2068 }
 0x361   :  { %3249 = vst [vmem:[#allocation31_spill] sm:$0xff] %v2975_v20 }
 0x362   :  { %1328 = vperm.xlu1 %1938, %v2912_v7  }
 0x363   :  { %1262 = vperm.xlu0 %1939, %v2914_v8  }
 0x366   :  { %1331 = vperm.xlu1 %1938, %v2920_v50  }
 0x367   :  { %1289 = vperm.xlu0 %1939, %v2922_v17  }
 0x36b   :  { %1292 = vperm.xlu0 %1939, %v2928_v6  }
 0x36f   :  { %1295 = vperm.xlu0 %1939, %v2933_v33  }
 0x373   :  { %1298 = vperm.xlu0 %1939, %v2938_v18  }
 0x377   :  { %1301 = vperm.xlu0 %1939, %v2943_v57  }
 0x37b   :  { %1307 = vperm.xlu0 %1939, %v2948_v44  }
 0x37f   :  { %1265 = vperm.xlu0 %1939, %v2953_v34  }
 0x383   :  { %1268 = vperm.xlu0 %1939, %v2958_v30  }
 0x387   :  { %1271 = vperm.xlu0 %1939, %v2963_v47  }
 0x38b   :  { %1274 = vperm.xlu0 %1939, %v2966_v32  }
 0x38f   :  { %1277 = vperm.xlu0 %1939, %v2969_v28  }
 0x393   :  { %1280 = vperm.xlu0 %1939, %v2972_v60  }
 0x397   :  { %1283 = vperm.xlu0 %1939, %v2975_v20  }
 0x3c1   :  { %v1287_v19 = vpop.permute.xlu1 %1286 }
 0x3c2   :  { %v1239_v12 = vpop.permute.xlu0 %1238  ;;  %v1415_v21 = vrot.slane %v1287_v19, %v3250_v3 }
 0x3c3   :  { %v1336_v59 = vrot.slane %v1239_v12, %v3250_v3 }
 0x3c5   :  { %v1305_v51 = vpop.permute.xlu1 %1304 }
 0x3c6   :  { %v1242_v42 = vpop.permute.xlu0 %1241 }
 0x3c7   :  { %v1340_v58 = vrot.slane %v1242_v42, %v3251_v1 }
 0x3c9   :  { %v1341_v52 = vsel %vm912_vm1, %v1340_v58, %v1336_v59  ;;  %v1311_v20 = vpop.permute.xlu1 %1310 }
 0x3ca   :  { %v1245_v25 = vpop.permute.xlu0 %1244 }
 0x3cd   :  { %v1314_v12 = vpop.permute.xlu1 %1313 }
 0x3ce   :  { %v1248_v38 = vpop.permute.xlu0 %1247 }
 0x3d1   :  { %v1317_v59 = vpop.permute.xlu1 %1316 }
 0x3d2   :  { %v1251_v56 = vpop.permute.xlu0 %1250 }
 0x3d6   :  { %v1254_v15 = vpop.permute.xlu0 %1253 }
 0x3da   :  { %v1257_v24 = vpop.permute.xlu0 %1256 }
 0x3de   :  { %v2981_v62 = vpop.permute.xlu0 %1259 }
 0x3e2   :  { %v2983_v46 = vpop.permute.xlu0 %1262 }
 0x3e6   :  { %v1290_v40 = vpop.permute.xlu0 %1289 }
 0x3e7   :  { %v1419_v42 = vrot.slane %v1290_v40, %v3251_v1  ;;  %v1320_v40 = vpop.permute.xlu1 %1319 }
 0x3e9   :  { %v1420_v33 = vsel %vm912_vm1, %v1419_v42, %v1415_v21 }
 0x3ea   :  { %v1293_v60 = vpop.permute.xlu0 %1292 }
 0x3eb   :  { %v1424_v58 = vrot.slane %v1293_v60, %v2682_v13 }
 0x3ed   :  { %v1425_v17 = vsel %vm919_vm2, %v1424_v58, %v1420_v33  ;;  %v1323_v33 = vpop.permute.xlu1 %1322 }
 0x3ee   :  { %v1296_v28 = vpop.permute.xlu0 %1295 }
 0x3ef   :  { %v1429_v44 = vrot.slane %v1296_v28, %v2695_v10  ;;  %v1444_v28 = vrot.slane %v1305_v51, %v2707_v53  ;;  %v1350_v51 = vrot.slane %v1248_v38, %v2695_v10 }
 0x3f1   :  { %v1430_v30 = vsel %vm3219_vm3, %v1429_v44, %v1425_v17  ;;  %v3252_v44 = vld [vmem:[#allocation25_spill] sm:$0xff] }
 0x3f2   :  { %v1299_v32 = vpop.permute.xlu0 %1298  ;;  %v1459_v58 = vrot.slane %v1314_v12, %v3252_v44 }
 0x3f3   :  { %v1434_v57 = vrot.slane %v1299_v32, %v2690_v37 }
 0x3f5   :  { %v1435_v1 = vsel %vm933_vm4, %v1434_v57, %v1430_v30  ;;  %v1464_v30 = vrot.slane %v1317_v59, %v2756_v11  ;;  %v1370_v59 = vrot.slane %v2981_v62, %v2713_v41 }
 0x3f6   :  { %v1302_v47 = vpop.permute.xlu0 %1301 }
 0x3f7   :  { %v1439_v6 = vrot.slane %v1302_v47, %v2699_v54  ;;  %v1454_v47 = vrot.slane %v1311_v20, %v2725_v5 }
 0x3f9   :  { %v1440_v60 = vsel %vm940_vm5, %v1439_v6, %v1435_v1  ;;  %v1326_v1 = vpop.permute.xlu1 %1325 }
 0x3fa   :  { %v1308_v16 = vpop.permute.xlu0 %1307  ;;  %v1445_v32 = vsel %vm947_vm6, %v1444_v28, %v1440_v60  ;;  %v1355_v60 = vrot.slane %v1251_v56, %v2690_v37  ;;  %v1469_v28 = vrot.slane %v1320_v40, %v2761_v39  ;;  %v1375_v40 = vrot.slane %v2983_v46, %v2725_v5 }
 0x3fb   :  { %v1449_v19 = vrot.slane %v1308_v16, %v2713_v41  ;;  %v1345_v16 = vrot.slane %v1245_v25, %v2682_v13 }
 0x3fd   :  { %v1450_v21 = vsel %vm954_vm7, %v1449_v19, %v1445_v32  ;;  %v1360_v32 = vrot.slane %v1254_v15, %v2699_v54  ;;  %v1346_v12 = vsel %vm919_vm2, %v1345_v16, %v1341_v52  ;;  %v1479_v16 = vrot.slane %v1326_v1, %v2771_v36 }
 0x3fe   :  { %v1266_v3 = vpop.permute.xlu0 %1265  ;;  %v1455_v17 = vsel %vm961_vm8, %v1454_v47, %v1450_v21  ;;  %v1365_v21 = vrot.slane %v1257_v24, %v2707_v53  ;;  %v1351_v25 = vsel %vm3219_vm3, %v1350_v51, %v1346_v12  ;;  %v1474_v47 = vrot.slane %v1323_v33, %v2766_v2 }
 0x3ff   :  { %v1460_v6 = vsel %vm968_vm9, %v1459_v58, %v1455_v17  ;;  %v1356_v56 = vsel %vm933_vm4, %v1355_v60, %v1351_v25  ;;  %v1329_v17 = vpop.permute.xlu1 %1328  ;;  %v1380_v24 = vrot.slane %v1266_v3, %v3252_v44  ;;  %vm3253_vm3 = vcmask 851712  }
 0x400   :  { %v1465_v20 = vsel %vm975_vm10, %v1464_v30, %v1460_v6  ;;  %v1361_v52 = vsel %vm940_vm5, %v1360_v32, %v1356_v56 }
 0x401   :  { %v1470_v38 = vsel %vm982_vm11, %v1469_v28, %v1465_v20  ;;  %v1366_v58 = vsel %vm947_vm6, %v1365_v21, %v1361_v52 }
 0x402   :  { %v1269_v42 = vpop.permute.xlu0 %1268  ;;  %v1475_v62 = vsel %vm3253_vm3, %v1474_v47, %v1470_v38  ;;  %v1371_v30 = vsel %vm954_vm7, %v1370_v59, %v1366_v58 }
 0x403   :  { %v1385_v6 = vrot.slane %v1269_v42, %v2756_v11  ;;  %v1376_v51 = vsel %vm961_vm8, %v1375_v40, %v1371_v30  ;;  %v1480_v28 = vsel %vm996_vm13, %v1479_v16, %v1475_v62  ;;  %v1484_v42 = vrot.slane %v1329_v17, %v2792_v9  ;;  %v1332_v32 = vpop.permute.xlu1 %1331 }
 0x404   :  { %v1381_v20 = vsel %vm968_vm9, %v1380_v24, %v1376_v51  ;;  %v1489_v59 = vrot.slane %v1332_v32, %v2789_v61 }
 0x405   :  { %v1386_v1 = vsel %vm975_vm10, %v1385_v6, %v1381_v20 }
 0x406   :  { %v1272_v57 = vpop.permute.xlu0 %1271 }
 0x407   :  { %v1390_v33 = vrot.slane %v1272_v57, %v2761_v39 }
 0x409   :  { %v1391_v57 = vsel %vm982_vm11, %v1390_v33, %v1386_v1 }
 0x40a   :  { %v1275_v19 = vpop.permute.xlu0 %1274 }
 0x40b   :  { %v1395_v46 = vrot.slane %v1275_v19, %v2766_v2  ;;  %v1485_v19 = vsel %vm1003_vm14, %v1484_v42, %v1480_v28  ;;  %v3258_v28 = vld [vmem:[#allocation18_spill] sm:$0xff]  ;;  %v3259_v42 = vld [vmem:[#allocation16_spill] sm:$0xff] }
 0x40c   :  { %v1490_v40 = vsel %vm1010_vm15, %v1489_v59, %v1485_v19  ;;  %v3263_v19 = vld [vmem:[#allocation19_spill] sm:$0xff] }
 0x40d   :  { %v1396_v21 = vsel %vm3253_vm3, %v1395_v46, %v1391_v57 }
 0x40e   :  { %v1278_v15 = vpop.permute.xlu0 %1277 }
 0x40f   :  { %v1400_v3 = vrot.slane %v1278_v15, %v2771_v36 }
 0x411   :  { %v1401_v38 = vsel %vm996_vm13, %v1400_v3, %v1396_v21  ;;  %v3257_v3 = vld [vmem:[#allocation29_spill] sm:$0xff] }
 0x412   :  { %v1281_v60 = vpop.permute.xlu0 %1280  ;;  %v3262_v21 = vld [vmem:[#allocation21_spill] sm:$0xff] }
 0x413   :  { %v1405_v12 = vrot.slane %v1281_v60, %v2792_v9 }
 0x415   :  { %v1406_v47 = vsel %vm1003_vm14, %v1405_v12, %v1401_v38  ;;  %v3261_v12 = vld [vmem:[#allocation27_spill] sm:$0xff]  ;;  %v3264_v38 = vld [vmem:[#allocation22_spill] sm:$0xff] }
 0x416   :  { %v1284_v25 = vpop.permute.xlu0 %1283 }
 0x417   :  { %v1410_v56 = vrot.slane %v1284_v25, %v2789_v61 }
 0x419   :  { %v1411_v17 = vsel %vm1010_vm15, %v1410_v56, %v1406_v47  ;;  %v3265_v47 = vld [vmem:[#allocation30_spill] sm:$0xff] }
 0x41a   :  { %v1491_v15 = vsel %vm1091_vm0, %v1490_v40, %v1411_v17  ;;  %v3266_v40 = vld [vmem:[#allocation31_spill] sm:$0xff] }
 0x41b   :  { %v1493_v52 = vsel %vm1094_vm12, %v1491_v15, 0.0  ;;  %vm3269_vm12 = vcmask 261312  }
 0x41c   :  { %1494 = vadd.xlane.f32.xlu0 %v1493_v52 }
 0x4a9   :  { %v1495_v24 = vpop.xlane.xlu0 %1494 }
 0x4aa   :  { %2070 = vrcp.f32 %v1495_v24 }
 0x4b4   :  { %v2071_v58 = vpop.eup %2070 }
 0x4b5   :  { %v3049_v6 = vrot.slane %v2071_v58, %v2321_v22  ;;  %v1505_v62 = vrot.slane %v2071_v58, %v2351_v55  ;;  %v3267_v58 = vld [vmem:[#allocation24_spill] sm:$0xff] }
 0x4b7   :  { %v1516_v16 = vmul.f32 %v2914_v8, %v3049_v6  ;;  %v1508_v30 = vmul.f32 %v2840_v14, %v3049_v6  ;;  %v1528_v33 = vmul.f32 %v2938_v18, %v1505_v62  ;;  %v1509_v51 = vmul.f32 %v2850_v43, %v3049_v6 }
 0x4b8   :  { %v1530_v22 = vmul.f32 %v2848_v29, %v1505_v62  ;;  %v1510_v55 = vmul.f32 %v2860_v45, %v3049_v6  ;;  %v1532_v8 = vmul.f32 %v2858_v49, %v1505_v62  ;;  %v1511_v14 = vmul.f32 %v2870_v35, %v3049_v6 }
 0x4b9   :  { %1597 = vperm.xlu0 %1939, %v1516_v16   ;;  %1573 = vperm.xlu1 %1938, %v1508_v30   ;;  %v1534_v18 = vmul.f32 %v2878_v4, %v1505_v62  ;;  %v1512_v43 = vmul.f32 %v2880_v48, %v3049_v6  ;;  %v1535_v29 = vmul.f32 %v2888_v27, %v1505_v62  ;;  %v3268_v16 = vld [vmem:[#allocation23_spill] sm:$0xff] }
 0x4ba   :  { %v1513_v45 = vmul.f32 %v2890_v0, %v3049_v6  ;;  %v1536_v49 = vmul.f32 %v2896_v26, %v1505_v62  ;;  %v1514_v35 = vmul.f32 %v2898_v31, %v3049_v6  ;;  %v1537_v4 = vmul.f32 %v2904_v23, %v1505_v62  ;;  %v3254_v31 = vld [vmem:[#allocation20_spill] sm:$0xff]  ;;  %v3255_v23 = vld [vmem:[#allocation26_spill] sm:$0xff] }
 0x4bb   :  { %v1515_v48 = vmul.f32 %v2906_v63, %v3049_v6  ;;  %v1538_v27 = vmul.f32 %v2912_v7, %v1505_v62  ;;  %v1517_v0 = vmul.f32 %v2953_v34, %v3049_v6  ;;  %v1539_v26 = vmul.f32 %v2920_v50, %v1505_v62  ;;  %v3256_v63 = vld [vmem:[#allocation28_spill] sm:$0xff]  ;;  %v3260_v50 = vld [vmem:[#allocation17_spill] sm:$0xff] }
 0x4bc   :  { %v1518_v46 = vmul.f32 %v3254_v31, %v3049_v6  ;;  %v1524_v60 = vmul.f32 %v3255_v23, %v1505_v62  ;;  %v1525_v20 = vmul.f32 %v3256_v63, %v1505_v62  ;;  %v1526_v7 = vmul.f32 %v3257_v3, %v1505_v62 }
 0x4bd   :  { %1633 = vperm.xlu0 %1939, %v1528_v33   ;;  %1576 = vperm.xlu1 %1938, %v1509_v51   ;;  %v1527_v34 = vmul.f32 %v3258_v28, %v1505_v62  ;;  %v1529_v32 = vmul.f32 %v3259_v42, %v1505_v62  ;;  %v1531_v1 = vmul.f32 %v3260_v50, %v1505_v62 }
 0x4be   :  { %v1533_v57 = vmul.f32 %v3261_v12, %v1505_v62  ;;  %v1519_v25 = vmul.f32 %v3262_v21, %v3049_v6  ;;  %v1520_v59 = vmul.f32 %v3263_v19, %v3049_v6  ;;  %v1521_v56 = vmul.f32 %v3264_v38, %v3049_v6 }
 0x4bf   :  { %v1522_v17 = vmul.f32 %v3265_v47, %v3049_v6  ;;  %v1523_v15 = vmul.f32 %v3266_v40, %v3049_v6 }
 0x4c1   :  { %1639 = vperm.xlu0 %1939, %v1530_v22   ;;  %1579 = vperm.xlu1 %1938, %v1510_v55  }
 0x4c5   :  { %1645 = vperm.xlu0 %1939, %v1532_v8   ;;  %1582 = vperm.xlu1 %1938, %v1511_v14  }
 0x4c9   :  { %1651 = vperm.xlu0 %1939, %v1534_v18   ;;  %1585 = vperm.xlu1 %1938, %v1512_v43  }
 0x4cd   :  { %1654 = vperm.xlu0 %1939, %v1535_v29   ;;  %1588 = vperm.xlu1 %1938, %v1513_v45  }
 0x4d1   :  { %1657 = vperm.xlu0 %1939, %v1536_v49   ;;  %1591 = vperm.xlu1 %1938, %v1514_v35  }
 0x4d5   :  { %1660 = vperm.xlu0 %1939, %v1537_v4   ;;  %1594 = vperm.xlu1 %1938, %v1515_v48  }
 0x4d9   :  { %1663 = vperm.xlu0 %1939, %v1538_v27   ;;  %1600 = vperm.xlu1 %1938, %v1517_v0  }
 0x4dd   :  { %1666 = vperm.xlu0 %1939, %v1539_v26   ;;  %1603 = vperm.xlu1 %1938, %v1518_v46  }
 0x4e1   :  { %1621 = vperm.xlu1 %1938, %v1524_v60  }
 0x4e5   :  { %1624 = vperm.xlu1 %1938, %v1525_v20  }
 0x4e9   :  { %1627 = vperm.xlu1 %1938, %v1526_v7  }
 0x4ed   :  { %1630 = vperm.xlu1 %1938, %v1527_v34  }
 0x4f1   :  { %1636 = vperm.xlu1 %1938, %v1529_v32  }
 0x4f5   :  { %1642 = vperm.xlu1 %1938, %v1531_v1  }
 0x4f9   :  { %1648 = vperm.xlu1 %1938, %v1533_v57  }
 0x4fd   :  { %1606 = vperm.xlu1 %1938, %v1519_v25  }
 0x501   :  { %1609 = vperm.xlu1 %1938, %v1520_v59  }
 0x505   :  { %1612 = vperm.xlu1 %1938, %v1521_v56  }
 0x509   :  { %1615 = vperm.xlu1 %1938, %v1522_v17  }
 0x50d   :  { %1618 = vperm.xlu1 %1938, %v1523_v15  }
 0x538   :  { %v1574_v52 = vpop.permute.xlu1 %1573  ;;  %v3103_v18 = vpop.permute.xlu0 %1597 }
 0x539   :  { %v1671_v62 = vrot.slane %v1574_v52, %v3267_v58 }
 0x53c   :  { %v1577_v24 = vpop.permute.xlu1 %1576  ;;  %v1634_v6 = vpop.permute.xlu0 %1633 }
 0x53d   :  { %v1675_v30 = vrot.slane %v1577_v24, %v3268_v16  ;;  %v1769_v34 = vrot.slane %v1634_v6, %v2690_v37 }
 0x53f   :  { %v1676_v33 = vsel %vm912_vm1, %v1675_v30, %v1671_v62 }
 0x540   :  { %v1580_v51 = vpop.permute.xlu1 %1579  ;;  %v1640_v49 = vpop.permute.xlu0 %1639 }
 0x541   :  { %v1779_v57 = vrot.slane %v1640_v49, %v2707_v53  ;;  %v1680_v47 = vrot.slane %v1580_v51, %v2682_v13 }
 0x543   :  { %v1681_v30 = vsel %vm919_vm2, %v1680_v47, %v1676_v33 }
 0x544   :  { %v1583_v22 = vpop.permute.xlu1 %1582  ;;  %v1646_v48 = vpop.permute.xlu0 %1645 }
 0x545   :  { %v1789_v56 = vrot.slane %v1646_v48, %v2725_v5  ;;  %v1685_v15 = vrot.slane %v1583_v22, %v2695_v10 }
 0x548   :  { %v1586_v55 = vpop.permute.xlu1 %1585  ;;  %v1652_v26 = vpop.permute.xlu0 %1651 }
 0x549   :  { %v1799_v24 = vrot.slane %v1652_v26, %v2756_v11 }
 0x54c   :  { %v1589_v8 = vpop.permute.xlu1 %1588  ;;  %v1655_v42 = vpop.permute.xlu0 %1654 }
 0x550   :  { %v1592_v14 = vpop.permute.xlu1 %1591  ;;  %v1658_v21 = vpop.permute.xlu0 %1657 }
 0x551   :  { %v1700_v6 = vrot.slane %v1592_v14, %v2707_v53 }
 0x554   :  { %v1595_v43 = vpop.permute.xlu1 %1594  ;;  %v1661_v62 = vpop.permute.xlu0 %1660 }
 0x555   :  { %v1705_v22 = vrot.slane %v1595_v43, %v2713_v41 }
 0x558   :  { %v3105_v29 = vpop.permute.xlu1 %1600  ;;  %v1664_v53 = vpop.permute.xlu0 %1663 }
 0x55c   :  { %v3107_v45 = vpop.permute.xlu1 %1603 }
 0x55d   :  { %v1720_v43 = vrot.slane %v3107_v45, %v2756_v11  ;;  %v1667_v11 = vpop.permute.xlu0 %1666 }
 0x560   :  { %v1622_v35 = vpop.permute.xlu1 %1621 }
 0x561   :  { %v1750_v23 = vrot.slane %v1622_v35, %v3267_v58  ;;  %v1690_v58 = vrot.slane %v1586_v55, %v2690_v37 }
 0x564   :  { %v1625_v4 = vpop.permute.xlu1 %1624 }
 0x565   :  { %v1754_v0 = vrot.slane %v1625_v4, %v3268_v16  ;;  %v1695_v16 = vrot.slane %v1589_v8, %v2699_v54  ;;  %v1715_v4 = vrot.slane %v3105_v29, %v3252_v44 }
 0x567   :  { %v1755_v63 = vsel %vm912_vm1, %v1754_v0, %v1750_v23  ;;  %vm3270_vm1 = vmmov %vm3269_vm12 }
 0x568   :  { %v1628_v27 = vpop.permute.xlu1 %1627  ;;  %v1686_v49 = vsel %vm3270_vm1, %v1685_v15, %v1681_v30 }
 0x569   :  { %v1759_v31 = vrot.slane %v1628_v27, %v2682_v13  ;;  %v1691_v35 = vsel %vm933_vm4, %v1690_v58, %v1686_v49  ;;  %v1814_v27 = vrot.slane %v1661_v62, %v2771_v36 }
 0x56a   :  { %v1696_v37 = vsel %vm940_vm5, %v1695_v16, %v1691_v35 }
 0x56b   :  { %v1760_v20 = vsel %vm919_vm2, %v1759_v31, %v1755_v63  ;;  %v1701_v33 = vsel %vm947_vm6, %v1700_v6, %v1696_v37  ;;  %vm3271_vm2 = vmmov %vm3253_vm3 }
 0x56c   :  { %v1631_v46 = vpop.permute.xlu1 %1630  ;;  %v1706_v14 = vsel %vm954_vm7, %v1705_v22, %v1701_v33 }
 0x56d   :  { %v1764_v60 = vrot.slane %v1631_v46, %v2695_v10  ;;  %v1804_v10 = vrot.slane %v1655_v42, %v2761_v39 }
 0x56f   :  { %v1765_v7 = vsel %vm3269_vm12, %v1764_v60, %v1760_v20 }
 0x570   :  { %v1637_v3 = vpop.permute.xlu1 %1636  ;;  %v1770_v32 = vsel %vm933_vm4, %v1769_v34, %v1765_v7  ;;  %vm3272_vm4 = vmmov %vm3271_vm2 }
 0x571   :  { %v1774_v28 = vrot.slane %v1637_v3, %v2699_v54  ;;  %v1809_v54 = vrot.slane %v1658_v21, %v2766_v2 }
 0x573   :  { %v1775_v1 = vsel %vm940_vm5, %v1774_v28, %v1770_v32 }
 0x574   :  { %v1643_v50 = vpop.permute.xlu1 %1642  ;;  %v1780_v25 = vsel %vm947_vm6, %v1779_v57, %v1775_v1 }
 0x575   :  { %v1784_v12 = vrot.slane %v1643_v50, %v2713_v41  ;;  %v1710_v41 = vrot.slane %v3103_v18, %v2725_v5  ;;  %v1819_v18 = vrot.slane %v1664_v53, %v2792_v9 }
 0x577   :  { %v1785_v59 = vsel %vm954_vm7, %v1784_v12, %v1780_v25  ;;  %v1711_v26 = vsel %vm961_vm8, %v1710_v41, %v1706_v14 }
 0x578   :  { %v1649_v19 = vpop.permute.xlu1 %1648  ;;  %v1790_v17 = vsel %vm961_vm8, %v1789_v56, %v1785_v59  ;;  %v1716_v23 = vsel %vm968_vm9, %v1715_v4, %v1711_v26 }
 0x579   :  { %v1794_v38 = vrot.slane %v1649_v19, %v3252_v44  ;;  %v1721_v29 = vsel %vm975_vm10, %v1720_v43, %v1716_v23 }
 0x57b   :  { %v1795_v52 = vsel %vm968_vm9, %v1794_v38, %v1790_v17 }
 0x57c   :  { %v1607_v40 = vpop.permute.xlu1 %1606  ;;  %v1800_v13 = vsel %vm975_vm10, %v1799_v24, %v1795_v52 }
 0x57d   :  { %v1805_v55 = vsel %vm982_vm11, %v1804_v10, %v1800_v13  ;;  %v1725_v0 = vrot.slane %v1607_v40, %v2761_v39 }
 0x57e   :  { %v1810_v48 = vsel %vm3271_vm2, %v1809_v54, %v1805_v55 }
 0x57f   :  { %v1815_v5 = vsel %vm996_vm13, %v1814_v27, %v1810_v48  ;;  %v1726_v39 = vsel %vm982_vm11, %v1725_v0, %v1721_v29 }
 0x580   :  { %v1610_v51 = vpop.permute.xlu1 %1609 }
 0x581   :  { %v1730_v31 = vrot.slane %v1610_v51, %v2766_v2  ;;  %v1820_v2 = vsel %vm1003_vm14, %v1819_v18, %v1815_v5 }
 0x583   :  { %v1731_v60 = vsel %vm3272_vm4, %v1730_v31, %v1726_v39 }
 0x584   :  { %v1613_v8 = vpop.permute.xlu1 %1612 }
 0x585   :  { %v1735_v44 = vrot.slane %v1613_v8, %v2771_v36  ;;  %v1824_v36 = vrot.slane %v1667_v11, %v2789_v61 }
 0x587   :  { %v1736_v20 = vsel %vm996_vm13, %v1735_v44, %v1731_v60 }
 0x588   :  { %v1616_v46 = vpop.permute.xlu1 %1615 }
 0x589   :  { %v1740_v45 = vrot.slane %v1616_v46, %v2792_v9  ;;  %v1825_v9 = vsel %vm1010_vm15, %v1824_v36, %v1820_v2 }
 0x58b   :  { %v1741_v7 = vsel %vm1003_vm14, %v1740_v45, %v1736_v20 }
 0x58c   :  { %v1619_v63 = vpop.permute.xlu1 %1618 }
 0x58d   :  { %v1745_v3 = vrot.slane %v1619_v63, %v2789_v61 }
 0x58f   :  { %v1746_v28 = vsel %vm1010_vm15, %v1745_v3, %v1741_v7 }
 0x590   :  { %v1826_v34 = vsel %vm1091_vm0, %v1825_v9, %v1746_v28 }
 0x591   :  { %1828 = vst [vmem:[#allocation11] sm:$0x3] %v1826_v34 }
 0x592   :  { %2193 = shalt.err (!%p2190_p2)
}
 0x593   :  { %s2194_s8 = scalar_lea.hbm %s3189_s5, 32 }
 0x594   :  { %p2195_p3 = scmp.ne.s32.totalorder %s3189_s5, %s2194_s8  ;;  %p2198_p4 = scmp.lt.u32.totalorder %s2194_s8, %s3189_s5 }
 0x596   :  { %p2200_p5 = pnand %p2198_p4, %p2195_p3 }
 0x598   :  { %2203 = shalt.err (!%p2200_p5)
}
 0x599   :  { %1838 = dma.vmem_to_hbm [thread:$0]  %s1836_s3, 32, %s3189_s5, [#allocation4]  }
 0x59a   :  { %2210 = dma.done.wait [#allocation4], 32  }
 0x59b   :  { %2211 = vsyncadd [#allocation4], 4294967264 }
 0x59c   :  { %1842 = vsyncpa [#allocation3], 1 }
 0x59d   :  { %1843 = vsyncpa [#allocation6], 1 }
 0x59e   :  { %1844 = vsyncpa [#allocation9], 1 }
 0x59f   :  { %1845 = vsyncpa [#allocation4], 1 }

</bundles_post_ra>
